<compile_context>
chip_gen: v7x
topology: tpu7x:2x2x1
jax: 0.10.0
libtpu: 0.0.40
codegen_flags: <defaults>
</compile_context>

<pallas_src>
import functools

import jax
import jax.numpy as jnp
from jax.experimental import pallas as pl
from jax.experimental.pallas import tpu as pltpu


def _logsigmoid(z):
    # numerically stable log(sigmoid(z))
    return jnp.minimum(z, 0.0) - jnp.log1p(jnp.exp(-jnp.abs(z)))


def bnre_tile_kernel(theta_ref, x_ref, bnd_ref,
                     w1t_ref, w1x_ref, b1_ref, w2_ref, b2_ref, w3_ref, b3_ref,
                     out_ref, *, n):
    i = pl.program_id(0)
    f32 = jnp.float32

    theta = theta_ref[...]                       # (T, D)  stream dtype
    x = x_ref[...]                               # (T, L)
    bnd_row = bnd_ref[...][0, 0:1, :]            # (1, D)  = theta[(i*T - 1) % N]

    w1t = w1t_ref[...]                           # (D, H)  stream dtype
    w1x = w1x_ref[...]                           # (L, H)
    w2 = w2_ref[...]                             # (H, H)
    b1 = b1_ref[...]                             # (1, H)  f32
    b2 = b2_ref[...]                             # (1, H)  f32
    w3 = w3_ref[...]                             # (1, H)  f32
    b3 = b3_ref[0]                               # scalar  f32 (SMEM)

    T = theta.shape[0]
    cdt = theta.dtype

    # --- layer 1, split over theta / x so x is streamed & multiplied once ---
    t1 = jnp.dot(theta, w1t, preferred_element_type=f32)          # (T, H)
    x1 = jnp.dot(x, w1x, preferred_element_type=f32)              # (T, H)
    t1_bnd = jnp.dot(bnd_row, w1t, preferred_element_type=f32)    # (1, H)

    # theta_prime[r] = theta[r-1]  =>  t1_prime[r] = t1[r-1]; row 0 comes from
    # the boundary row (previous tile's last row / wrap-around for tile 0).
    t1_rot = pltpu.roll(t1, shift=1, axis=0)                      # XLU, ~free
    row_id = jax.lax.broadcasted_iota(jnp.int32, t1.shape, 0)
    t1_prime = jnp.where(row_id == 0, t1_bnd, t1_rot)             # (T, H)

    pre = x1 + b1                                                 # shared term
    h = jnp.maximum(t1 + pre, 0.0)
    hp = jnp.maximum(t1_prime + pre, 0.0)

    # --- layer 2 (MXU, f32 accumulation) ---
    h2 = jnp.maximum(jnp.dot(h.astype(cdt), w2, preferred_element_type=f32) + b2, 0.0)
    h2p = jnp.maximum(jnp.dot(hp.astype(cdt), w2, preferred_element_type=f32) + b2, 0.0)

    # --- layer 3: 1-wide projection kept off the MXU (VPU mul + XLU reduce) ---
    log_r = jnp.sum(h2 * w3, axis=-1, keepdims=True) + b3         # (T, 1)
    log_rp = jnp.sum(h2p * w3, axis=-1, keepdims=True) + b3       # (T, 1)

    ls_r = _logsigmoid(log_r)
    ls_nrp = _logsigmoid(-log_rp)
    # sigmoid(log_r) = exp(logsigmoid(log_r)),
    # sigmoid(log_rp) = 1 - exp(logsigmoid(-log_rp))  ->  reuse the exponentials:
    bal = jnp.exp(ls_r) - jnp.exp(ls_nrp)        # = sig(log_r) + sig(log_rp) - 1

    # mask padded rows of the (possibly ragged) last tile
    rows = jax.lax.broadcasted_iota(jnp.int32, (T, 1), 0) + i * T
    valid = rows < n
    zero = jnp.zeros_like(ls_r)
    s1 = jnp.sum(jnp.where(valid, ls_r, zero), keepdims=True)     # (1, 1)
    s0 = jnp.sum(jnp.where(valid, ls_nrp, zero), keepdims=True)
    sb = jnp.sum(jnp.where(valid, bal, zero), keepdims=True)

    # per-tile partial sums -> one lane-dense (8,128) slab; sublanes 0/1/2
    # carry s1/s0/sb (broadcast over lanes) so the store is an unmasked vst.
    r8 = jax.lax.broadcasted_iota(jnp.int32, (8, 128), 0)
    slab = jnp.where(r8 == 0, s1,
                     jnp.where(r8 == 1, s0,
                               jnp.where(r8 == 2, sb, 0.0)))
    out_ref[0] = slab


def bnre_loss(theta, x, params, lmbda=100.0, *,
              tile_rows=512, stream_dtype=jnp.float32):
    """Balanced NRE loss with the built-in 3-layer MLP estimator."""
    n, d = theta.shape
    n_x, l = x.shape
    assert n == n_x
    assert tile_rows % 8 == 0
    w1, b1, w2, b2, w3, b3 = params
    hdim = w1.shape[1]

    num_tiles = pl.cdiv(n, tile_rows)
    n_pad = num_tiles * tile_rows

    # Split W1 over the theta / x halves of the (virtual) concatenated input.
    w1t = w1[:d, :].astype(stream_dtype)
    w1x = w1[d:, :].astype(stream_dtype)
    w2c = w2.astype(stream_dtype)
    b1f = jnp.asarray(b1, jnp.float32).reshape(1, hdim)
    b2f = jnp.asarray(b2, jnp.float32).reshape(1, hdim)
    w3r = jnp.asarray(w3, jnp.float32).reshape(1, hdim)
    b3s = jnp.asarray(b3, jnp.float32).reshape((1,))

    theta_s = theta.astype(stream_dtype)
    x_s = x.astype(stream_dtype)
    if n_pad != n:
        theta_s = jnp.pad(theta_s, ((0, n_pad - n), (0, 0)))
        x_s = jnp.pad(x_s, ((0, n_pad - n), (0, 0)))

    # Boundary theta row per tile: the rolled theta of tile i's first row is
    # theta[(i*tile_rows - 1) % n] (wraps to theta[n-1] for tile 0).
    bidx = (jnp.arange(num_tiles) * tile_rows - 1) % n
    bnd = theta.astype(stream_dtype)[bidx]                          # (G, D)
    bnd = jnp.broadcast_to(bnd[:, None, :], (num_tiles, 8, d))      # sublane pad

    kernel = functools.partial(bnre_tile_kernel, n=n)

    itm = jnp.dtype(stream_dtype).itemsize
    cost = pl.CostEstimate(
        flops=int(4 * n * hdim * (d + l + 2 * hdim + 2)),
        transcendentals=int(6 * n),
        bytes_accessed=int((theta_s.size + x_s.size + bnd.size
                            + w1t.size + w1x.size + w2c.size) * itm
                           + (b1f.size + b2f.size + w3r.size + b3s.size) * 4
                           + num_tiles * 8 * 128 * 4),
    )

    partials = pl.pallas_call(
        kernel,
        out_shape=jax.ShapeDtypeStruct((num_tiles, 8, 128), jnp.float32),
        grid=(num_tiles,),
        in_specs=[
            pl.BlockSpec((tile_rows, d), lambda i: (i, 0)),       # theta tile
            pl.BlockSpec((tile_rows, l), lambda i: (i, 0)),       # x tile
            pl.BlockSpec((1, 8, d), lambda i: (i, 0, 0)),         # boundary row
            pl.BlockSpec((d, hdim), lambda i: (0, 0)),            # W1_theta (resident)
            pl.BlockSpec((l, hdim), lambda i: (0, 0)),            # W1_x
            pl.BlockSpec((1, hdim), lambda i: (0, 0)),            # b1
            pl.BlockSpec((hdim, hdim), lambda i: (0, 0)),         # W2
            pl.BlockSpec((1, hdim), lambda i: (0, 0)),            # b2
            pl.BlockSpec((1, hdim), lambda i: (0, 0)),            # w3 row
            pl.BlockSpec(memory_space=pltpu.MemorySpace.SMEM),    # b3 scalar
        ],
        out_specs=pl.BlockSpec((1, 8, 128), lambda i: (i, 0, 0)),
        compiler_params=pltpu.CompilerParams(
            dimension_semantics=("parallel",)),
        cost_estimate=cost,
    )(theta_s, x_s, bnd, w1t, w1x, b1f, w2c, b2f, w3r, b3s)

    # tiny final reduction over per-tile partial sums (plain JAX)
    s1 = jnp.sum(partials[:, 0, 0])
    s0 = jnp.sum(partials[:, 1, 0])
    sb = jnp.sum(partials[:, 2, 0])
    l1 = -(s1 / n)
    l0 = -(s0 / n)
    lb = jnp.square(sb / n)
    return (l1 + l0) * 0.5 + lmbda * lb


def bnre_loss_reference(theta, x, params, lmbda=100.0):
    """Plain-JAX reference mirroring the PyTorch module."""
    w1, b1, w2, b2, w3, b3 = params
    theta_prime = jnp.roll(theta, 1, axis=0)

    def estimator(th, xx):
        z = jnp.concatenate([th, xx], axis=-1)
        hh = jnp.maximum(z @ w1 + b1, 0.0)
        hh = jnp.maximum(hh @ w2 + b2, 0.0)
        return (hh @ w3 + b3)[:, 0]

    log_r = estimator(theta, x)
    log_r_prime = estimator(theta_prime, x)
    l1 = -jnp.mean(jax.nn.log_sigmoid(log_r))
    l0 = -jnp.mean(jax.nn.log_sigmoid(-log_r_prime))
    lb = jnp.square(jnp.mean(jax.nn.sigmoid(log_r) + jax.nn.sigmoid(log_r_prime) - 1.0))
    return (l1 + l0) / 2.0 + lmbda * lb


if __name__ == "__main__":
    # N=200 with tile_rows=128 -> 2-tile grid, ragged last tile + wrap-around row.
    N, D, L, H = 200, 4, 8, 32
    Fdim = D + L

    key = jax.random.PRNGKey(0)
    ks = jax.random.split(key, 8)
    theta = jax.random.normal(ks[0], (N, D), jnp.float32)
    x = jax.random.normal(ks[1], (N, L), jnp.float32)

    # Deterministic synthetic estimator parameters.
    w1 = jax.random.normal(ks[2], (Fdim, H), jnp.float32) / jnp.sqrt(Fdim)
    b1 = 0.1 * jax.random.normal(ks[3], (1, H), jnp.float32)
    w2 = jax.random.normal(ks[4], (H, H), jnp.float32) / jnp.sqrt(H)
    b2 = 0.1 * jax.random.normal(ks[5], (1, H), jnp.float32)
    w3 = jax.random.normal(ks[6], (H, 1), jnp.float32) / jnp.sqrt(H)
    b3 = 0.1 * jax.random.normal(ks[7], (1, 1), jnp.float32)
    params = (w1, b1, w2, b2, w3, b3)

    ref = jax.block_until_ready(bnre_loss_reference(theta, x, params, lmbda=100.0))

    # f32 streaming: tight check against the plain-JAX reference.
    loss = jax.block_until_ready(
        bnre_loss(theta, x, params, lmbda=100.0,
                  tile_rows=128, stream_dtype=jnp.float32))
    assert jnp.isfinite(loss), loss
    assert jnp.allclose(loss, ref, rtol=1e-3, atol=1e-3), (loss, ref)

    # bf16 streaming (recommended for v6e/v7x): loose sanity check.
    loss_bf16 = jax.block_until_ready(
        bnre_loss(theta, x, params, lmbda=100.0,
                  tile_rows=128, stream_dtype=jnp.bfloat16))
    assert jnp.isfinite(loss_bf16), loss_bf16
    assert jnp.allclose(loss_bf16, ref, rtol=5e-2, atol=5e-2), (loss_bf16, ref)

    print("KERNEL_OK")
</pallas_src>

<mosaic_0001>
module attributes {stable_mosaic.version = 11 : i64} {
  func.func @bnre_tile_kernel(%arg0: i32, %arg1: memref<128x4xf32, #tpu.memory_space<vmem>>, %arg2: memref<128x8xf32, #tpu.memory_space<vmem>>, %arg3: memref<1x8x4xf32, #tpu.memory_space<vmem>>, %arg4: memref<4x32xf32, #tpu.memory_space<vmem>>, %arg5: memref<8x32xf32, #tpu.memory_space<vmem>>, %arg6: memref<1x32xf32, #tpu.memory_space<vmem>>, %arg7: memref<32x32xf32, #tpu.memory_space<vmem>>, %arg8: memref<1x32xf32, #tpu.memory_space<vmem>>, %arg9: memref<1x32xf32, #tpu.memory_space<vmem>>, %arg10: memref<1xf32, #tpu.memory_space<smem>>, %arg11: memref<1x8x128xf32, #tpu.memory_space<vmem>>) attributes {dimension_semantics = [#tpu.dimension_semantics<parallel>], iteration_bounds = array<i64: 2>, scalar_prefetch = 0 : i64, scratch_operands = 0 : i64, tpu.core_type = #tpu.core_type<tc>, window_params = [{transform_indices = @transform_0, window_bounds = array<i64: 128, 4>}, {transform_indices = @transform_1, window_bounds = array<i64: 128, 8>}, {transform_indices = @transform_2, window_bounds = array<i64: 1, 8, 4>}, {pipeline_mode = #tpu.pipeline_mode<synchronous>, transform_indices = @transform_3, window_bounds = array<i64: 4, 32>}, {pipeline_mode = #tpu.pipeline_mode<synchronous>, transform_indices = @transform_4, window_bounds = array<i64: 8, 32>}, {pipeline_mode = #tpu.pipeline_mode<synchronous>, transform_indices = @transform_5, window_bounds = array<i64: 1, 32>}, {pipeline_mode = #tpu.pipeline_mode<synchronous>, transform_indices = @transform_6, window_bounds = array<i64: 32, 32>}, {pipeline_mode = #tpu.pipeline_mode<synchronous>, transform_indices = @transform_7, window_bounds = array<i64: 1, 32>}, {pipeline_mode = #tpu.pipeline_mode<synchronous>, transform_indices = @transform_8, window_bounds = array<i64: 1, 32>}, {transform_indices = @transform_9, window_bounds = array<i64: 1>}, {transform_indices = @transform_10, window_bounds = array<i64: 1, 8, 128>}]} {
    %c0 = arith.constant 0 : index
    %c0_0 = arith.constant 0 : index
    %0 = vector.load %arg1[%c0, %c0_0] : memref<128x4xf32, #tpu.memory_space<vmem>>, vector<128x4xf32>
    %c0_1 = arith.constant 0 : index
    %c0_2 = arith.constant 0 : index
    %1 = vector.load %arg2[%c0_1, %c0_2] : memref<128x8xf32, #tpu.memory_space<vmem>>, vector<128x8xf32>
    %c0_3 = arith.constant 0 : index
    %c0_4 = arith.constant 0 : index
    %c0_5 = arith.constant 0 : index
    %2 = vector.load %arg3[%c0_3, %c0_4, %c0_5] : memref<1x8x4xf32, #tpu.memory_space<vmem>>, vector<1x8x4xf32>
    %3 = vector.extract_strided_slice %2 {offsets = [0, 0, 0], sizes = [1, 1, 4], strides = [1, 1, 1]} : vector<1x8x4xf32> to vector<1x1x4xf32>
    %4 = vector.shape_cast %3 : vector<1x1x4xf32> to vector<1x4xf32>
    %c0_6 = arith.constant 0 : index
    %c0_7 = arith.constant 0 : index
    %5 = vector.load %arg4[%c0_6, %c0_7] : memref<4x32xf32, #tpu.memory_space<vmem>>, vector<4x32xf32>
    %c0_8 = arith.constant 0 : index
    %c0_9 = arith.constant 0 : index
    %6 = vector.load %arg5[%c0_8, %c0_9] : memref<8x32xf32, #tpu.memory_space<vmem>>, vector<8x32xf32>
    %c0_10 = arith.constant 0 : index
    %c0_11 = arith.constant 0 : index
    %7 = vector.load %arg7[%c0_10, %c0_11] : memref<32x32xf32, #tpu.memory_space<vmem>>, vector<32x32xf32>
    %c0_12 = arith.constant 0 : index
    %c0_13 = arith.constant 0 : index
    %8 = vector.load %arg6[%c0_12, %c0_13] : memref<1x32xf32, #tpu.memory_space<vmem>>, vector<1x32xf32>
    %c0_14 = arith.constant 0 : index
    %c0_15 = arith.constant 0 : index
    %9 = vector.load %arg8[%c0_14, %c0_15] : memref<1x32xf32, #tpu.memory_space<vmem>>, vector<1x32xf32>
    %c0_16 = arith.constant 0 : index
    %c0_17 = arith.constant 0 : index
    %10 = vector.load %arg9[%c0_16, %c0_17] : memref<1x32xf32, #tpu.memory_space<vmem>>, vector<1x32xf32>
    %c0_18 = arith.constant 0 : index
    %11 = memref.load %arg10[%c0_18] : memref<1xf32, #tpu.memory_space<smem>>
    %cst = arith.constant dense<0.000000e+00> : vector<128x32xf32>
    %12 = tpu.matmul %0, %5, %cst {dimension_numbers = #tpu.dot_dimension_numbers<[1], [0], [0], [1], [0, 0, 1, 1], [], []>} : vector<128x4xf32>, vector<4x32xf32>, vector<128x32xf32> -> vector<128x32xf32>
    %cst_19 = arith.constant dense<0.000000e+00> : vector<128x32xf32>
    %13 = tpu.matmul %1, %6, %cst_19 {dimension_numbers = #tpu.dot_dimension_numbers<[1], [0], [0], [1], [0, 0, 1, 1], [], []>} : vector<128x8xf32>, vector<8x32xf32>, vector<128x32xf32> -> vector<128x32xf32>
    %cst_20 = arith.constant dense<0.000000e+00> : vector<1x32xf32>
    %14 = tpu.matmul %4, %5, %cst_20 {dimension_numbers = #tpu.dot_dimension_numbers<[1], [0], [0], [1], [0, 0, 1, 1], [], []>} : vector<1x4xf32>, vector<4x32xf32>, vector<1x32xf32> -> vector<1x32xf32>
    %c1_i32 = arith.constant 1 : i32
    %15 = tpu.dynamic_rotate %12 by %c1_i32 dim 0 : vector<128x32xf32>, i32 -> vector<128x32xf32>
    %16 = tpu.iota {dimensions = array<i32: 0>} : vector<128x32xi32>
    %c0_i32 = arith.constant 0 : i32
    %17 = vector.broadcast %c0_i32 : i32 to vector<128x32xi32>
    %18 = arith.cmpi eq, %16, %17 : vector<128x32xi32>
    %19 = vector.shape_cast %14 : vector<1x32xf32> to vector<1x32xf32>
    %20 = vector.broadcast %19 : vector<1x32xf32> to vector<128x32xf32>
    %21 = arith.select %18, %20, %15 : vector<128x32xi1>, vector<128x32xf32>
    %22 = vector.broadcast %8 : vector<1x32xf32> to vector<128x32xf32>
    %23 = arith.addf %13, %22 : vector<128x32xf32>
    %24 = arith.addf %12, %23 : vector<128x32xf32>
    %cst_21 = arith.constant 0.000000e+00 : f32
    %25 = vector.broadcast %cst_21 : f32 to vector<128x32xf32>
    %26 = arith.maximumf %24, %25 : vector<128x32xf32>
    %27 = arith.addf %21, %23 : vector<128x32xf32>
    %cst_22 = arith.constant 0.000000e+00 : f32
    %28 = vector.broadcast %cst_22 : f32 to vector<128x32xf32>
    %29 = arith.maximumf %27, %28 : vector<128x32xf32>
    %cst_23 = arith.constant dense<0.000000e+00> : vector<128x32xf32>
    %30 = tpu.matmul %26, %7, %cst_23 {dimension_numbers = #tpu.dot_dimension_numbers<[1], [0], [0], [1], [0, 0, 1, 1], [], []>} : vector<128x32xf32>, vector<32x32xf32>, vector<128x32xf32> -> vector<128x32xf32>
    %31 = vector.broadcast %9 : vector<1x32xf32> to vector<128x32xf32>
    %32 = arith.addf %30, %31 : vector<128x32xf32>
    %cst_24 = arith.constant 0.000000e+00 : f32
    %33 = vector.broadcast %cst_24 : f32 to vector<128x32xf32>
    %34 = arith.maximumf %32, %33 : vector<128x32xf32>
    %cst_25 = arith.constant dense<0.000000e+00> : vector<128x32xf32>
    %35 = tpu.matmul %29, %7, %cst_25 {dimension_numbers = #tpu.dot_dimension_numbers<[1], [0], [0], [1], [0, 0, 1, 1], [], []>} : vector<128x32xf32>, vector<32x32xf32>, vector<128x32xf32> -> vector<128x32xf32>
    %36 = vector.broadcast %9 : vector<1x32xf32> to vector<128x32xf32>
    %37 = arith.addf %35, %36 : vector<128x32xf32>
    %cst_26 = arith.constant 0.000000e+00 : f32
    %38 = vector.broadcast %cst_26 : f32 to vector<128x32xf32>
    %39 = arith.maximumf %37, %38 : vector<128x32xf32>
    %40 = vector.broadcast %10 : vector<1x32xf32> to vector<128x32xf32>
    %41 = arith.mulf %34, %40 : vector<128x32xf32>
    %cst_27 = arith.constant dense<0.000000e+00> : vector<128xf32>
    %42 = vector.multi_reduction <add>, %41, %cst_27 [1] : vector<128x32xf32> to vector<128xf32>
    %43 = vector.shape_cast %42 : vector<128xf32> to vector<128x1xf32>
    %44 = vector.broadcast %11 : f32 to vector<128x1xf32>
    %45 = arith.addf %43, %44 : vector<128x1xf32>
    %46 = vector.broadcast %10 : vector<1x32xf32> to vector<128x32xf32>
    %47 = arith.mulf %39, %46 : vector<128x32xf32>
    %cst_28 = arith.constant dense<0.000000e+00> : vector<128xf32>
    %48 = vector.multi_reduction <add>, %47, %cst_28 [1] : vector<128x32xf32> to vector<128xf32>
    %49 = vector.shape_cast %48 : vector<128xf32> to vector<128x1xf32>
    %50 = vector.broadcast %11 : f32 to vector<128x1xf32>
    %51 = arith.addf %49, %50 : vector<128x1xf32>
    %cst_29 = arith.constant 0.000000e+00 : f32
    %52 = vector.broadcast %cst_29 : f32 to vector<128x1xf32>
    %53 = arith.minimumf %45, %52 : vector<128x1xf32>
    %54 = math.absf %45 : vector<128x1xf32>
    %cst_30 = arith.constant 0.000000e+00 : f32
    %55 = vector.broadcast %cst_30 : f32 to vector<128x1xf32>
    %56 = arith.subf %55, %54 : vector<128x1xf32>
    %57 = math.exp %56 : vector<128x1xf32>
    %58 = math.log1p %57 : vector<128x1xf32>
    %59 = arith.subf %53, %58 : vector<128x1xf32>
    %cst_31 = arith.constant 0.000000e+00 : f32
    %60 = vector.broadcast %cst_31 : f32 to vector<128x1xf32>
    %61 = arith.subf %60, %51 : vector<128x1xf32>
    %cst_32 = arith.constant 0.000000e+00 : f32
    %62 = vector.broadcast %cst_32 : f32 to vector<128x1xf32>
    %63 = arith.minimumf %61, %62 : vector<128x1xf32>
    %64 = math.absf %61 : vector<128x1xf32>
    %cst_33 = arith.constant 0.000000e+00 : f32
    %65 = vector.broadcast %cst_33 : f32 to vector<128x1xf32>
    %66 = arith.subf %65, %64 : vector<128x1xf32>
    %67 = math.exp %66 : vector<128x1xf32>
    %68 = math.log1p %67 : vector<128x1xf32>
    %69 = arith.subf %63, %68 : vector<128x1xf32>
    %70 = math.exp %59 : vector<128x1xf32>
    %71 = math.exp %69 : vector<128x1xf32>
    %72 = arith.subf %70, %71 : vector<128x1xf32>
    %73 = tpu.iota {dimensions = array<i32: 0>} : vector<128x1xi32>
    %c128_i32 = arith.constant 128 : i32
    %74 = arith.muli %arg0, %c128_i32 : i32
    %75 = vector.broadcast %74 : i32 to vector<128x1xi32>
    %76 = arith.addi %73, %75 : vector<128x1xi32>
    %c200_i32 = arith.constant 200 : i32
    %77 = vector.broadcast %c200_i32 : i32 to vector<128x1xi32>
    %78 = arith.cmpi slt, %76, %77 : vector<128x1xi32>
    %cst_34 = arith.constant 0.000000e+00 : f32
    %79 = vector.broadcast %cst_34 : f32 to vector<128x1xf32>
    %80 = arith.select %78, %59, %79 : vector<128x1xi1>, vector<128x1xf32>
    %81 = vector.shape_cast %80 : vector<128x1xf32> to vector<1x128x1xf32>
    %cst_35 = arith.constant dense<0.000000e+00> : vector<1xf32>
    %82 = vector.multi_reduction <add>, %81, %cst_35 [1, 2] : vector<1x128x1xf32> to vector<1xf32>
    %83 = vector.shape_cast %82 : vector<1xf32> to vector<1x1x1xf32>
    %84 = vector.extract %83[0, 0, 0] : f32 from vector<1x1x1xf32>
    %85 = vector.broadcast %84 : f32 to vector<1x1xf32>
    %86 = arith.select %78, %69, %79 : vector<128x1xi1>, vector<128x1xf32>
    %87 = vector.shape_cast %86 : vector<128x1xf32> to vector<1x128x1xf32>
    %cst_36 = arith.constant dense<0.000000e+00> : vector<1xf32>
    %88 = vector.multi_reduction <add>, %87, %cst_36 [1, 2] : vector<1x128x1xf32> to vector<1xf32>
    %89 = vector.shape_cast %88 : vector<1xf32> to vector<1x1x1xf32>
    %90 = vector.extract %89[0, 0, 0] : f32 from vector<1x1x1xf32>
    %91 = vector.broadcast %90 : f32 to vector<1x1xf32>
    %92 = arith.select %78, %72, %79 : vector<128x1xi1>, vector<128x1xf32>
    %93 = vector.shape_cast %92 : vector<128x1xf32> to vector<1x128x1xf32>
    %cst_37 = arith.constant dense<0.000000e+00> : vector<1xf32>
    %94 = vector.multi_reduction <add>, %93, %cst_37 [1, 2] : vector<1x128x1xf32> to vector<1xf32>
    %95 = vector.shape_cast %94 : vector<1xf32> to vector<1x1x1xf32>
    %96 = vector.extract %95[0, 0, 0] : f32 from vector<1x1x1xf32>
    %97 = vector.broadcast %96 : f32 to vector<1x1xf32>
    %98 = tpu.iota {dimensions = array<i32: 0>} : vector<8x128xi32>
    %c0_i32_38 = arith.constant 0 : i32
    %99 = vector.broadcast %c0_i32_38 : i32 to vector<8x128xi32>
    %100 = arith.cmpi eq, %98, %99 : vector<8x128xi32>
    %c1_i32_39 = arith.constant 1 : i32
    %101 = vector.broadcast %c1_i32_39 : i32 to vector<8x128xi32>
    %102 = arith.cmpi eq, %98, %101 : vector<8x128xi32>
    %c2_i32 = arith.constant 2 : i32
    %103 = vector.broadcast %c2_i32 : i32 to vector<8x128xi32>
    %104 = arith.cmpi eq, %98, %103 : vector<8x128xi32>
    %cst_40 = arith.constant 0.000000e+00 : f32
    %105 = vector.shape_cast %97 : vector<1x1xf32> to vector<1x1xf32>
    %106 = vector.broadcast %105 : vector<1x1xf32> to vector<8x128xf32>
    %107 = vector.broadcast %cst_40 : f32 to vector<8x128xf32>
    %108 = arith.select %104, %106, %107 : vector<8x128xi1>, vector<8x128xf32>
    %109 = vector.shape_cast %91 : vector<1x1xf32> to vector<1x1xf32>
    %110 = vector.broadcast %109 : vector<1x1xf32> to vector<8x128xf32>
    %111 = arith.select %102, %110, %108 : vector<8x128xi1>, vector<8x128xf32>
    %112 = vector.shape_cast %85 : vector<1x1xf32> to vector<1x1xf32>
    %113 = vector.broadcast %112 : vector<1x1xf32> to vector<8x128xf32>
    %114 = arith.select %100, %113, %111 : vector<8x128xi1>, vector<8x128xf32>
    %c0_41 = arith.constant 0 : index
    %c0_42 = arith.constant 0 : index
    %c0_43 = arith.constant 0 : index
    %115 = vector.load %arg11[%c0_41, %c0_42, %c0_43] : memref<1x8x128xf32, #tpu.memory_space<vmem>>, vector<1x8x128xf32>
    %116 = vector.shape_cast %115 : vector<1x8x128xf32> to vector<8x128xf32>
    %117 = vector.shape_cast %114 : vector<8x128xf32> to vector<1x8x128xf32>
    tpu.vector_store %arg11[%c0_41, %c0_42, %c0_43], %117 {strides = array<i32>} : memref<1x8x128xf32, #tpu.memory_space<vmem>>, vector<1x8x128xf32>,
    return
  }
  func.func @transform_0(%arg0: i32) -> (i32, i32) {
    %c0_i32 = arith.constant 0 : i32
    %c0_i32_0 = arith.constant 0 : i32
    return %arg0, %c0_i32 : i32, i32
  }
  func.func @transform_1(%arg0: i32) -> (i32, i32) {
    %c0_i32 = arith.constant 0 : i32
    %c0_i32_0 = arith.constant 0 : i32
    return %arg0, %c0_i32 : i32, i32
  }
  func.func @transform_2(%arg0: i32) -> (i32, i32, i32) {
    %c0_i32 = arith.constant 0 : i32
    %c0_i32_0 = arith.constant 0 : i32
    %c0_i32_1 = arith.constant 0 : i32
    return %arg0, %c0_i32, %c0_i32_0 : i32, i32, i32
  }
  func.func @transform_3(%arg0: i32) -> (i32, i32) {
    %c0_i32 = arith.constant 0 : i32
    %c0_i32_0 = arith.constant 0 : i32
    %c0_i32_1 = arith.constant 0 : i32
    return %c0_i32, %c0_i32_0 : i32, i32
  }
  func.func @transform_4(%arg0: i32) -> (i32, i32) {
    %c0_i32 = arith.constant 0 : i32
    %c0_i32_0 = arith.constant 0 : i32
    %c0_i32_1 = arith.constant 0 : i32
    return %c0_i32, %c0_i32_0 : i32, i32
  }
  func.func @transform_5(%arg0: i32) -> (i32, i32) {
    %c0_i32 = arith.constant 0 : i32
    %c0_i32_0 = arith.constant 0 : i32
    %c0_i32_1 = arith.constant 0 : i32
    return %c0_i32, %c0_i32_0 : i32, i32
  }
  func.func @transform_6(%arg0: i32) -> (i32, i32) {
    %c0_i32 = arith.constant 0 : i32
    %c0_i32_0 = arith.constant 0 : i32
    %c0_i32_1 = arith.constant 0 : i32
    return %c0_i32, %c0_i32_0 : i32, i32
  }
  func.func @transform_7(%arg0: i32) -> (i32, i32) {
    %c0_i32 = arith.constant 0 : i32
    %c0_i32_0 = arith.constant 0 : i32
    %c0_i32_1 = arith.constant 0 : i32
    return %c0_i32, %c0_i32_0 : i32, i32
  }
  func.func @transform_8(%arg0: i32) -> (i32, i32) {
    %c0_i32 = arith.constant 0 : i32
    %c0_i32_0 = arith.constant 0 : i32
    %c0_i32_1 = arith.constant 0 : i32
    return %c0_i32, %c0_i32_0 : i32, i32
  }
  func.func @transform_9(%arg0: i32) -> i32 {
    %c0_i32 = arith.constant 0 : i32
    %c0_i32_0 = arith.constant 0 : i32
    return %c0_i32 : i32
  }
  func.func @transform_10(%arg0: i32) -> (i32, i32, i32) {
    %c0_i32 = arith.constant 0 : i32
    %c0_i32_0 = arith.constant 0 : i32
    %c0_i32_1 = arith.constant 0 : i32
    return %arg0, %c0_i32, %c0_i32_0 : i32, i32, i32
  }
}

</mosaic_0001>

<bundles_post_ra>
// kernel: tpu_custom_call.1
= control target key start
LH: loop header
LB: loop body
LE: loop exit
PB: predicated region body
PF: predicated region fallthrough
CT: control target
= control target key end

     0   :  { %s4645_s0 = inlined_call_operand.vmem [shape: f32[256,4], index: 0, kind: input, shape index: {}]   ;;  %s4646_s1 = inlined_call_operand.vmem [shape: f32[256,8], index: 1, kind: input, shape index: {}]   ;;  %s4647_s2 = inlined_call_operand.vmem [shape: f32[2,8,4], index: 2, kind: input, shape index: {}]   ;;  %s4648_s3 = inlined_call_operand.vmem [shape: f32[4,32], index: 3, kind: input, shape index: {}]   ;;  %s4649_s4 = inlined_call_operand.vmem [shape: f32[8,32], index: 4, kind: input, shape index: {}]   ;;  %s4650_s5 = inlined_call_operand.vmem [shape: f32[1,32], index: 5, kind: input, shape index: {}]   ;;  %s4651_s6 = inlined_call_operand.vmem [shape: f32[32,32], index: 6, kind: input, shape index: {}]   ;;  %s4652_s7 = inlined_call_operand.vmem [shape: f32[1,32], index: 7, kind: input, shape index: {}]   ;;  %s4653_s8 = inlined_call_operand.vmem [shape: f32[1,32], index: 8, kind: input, shape index: {}]   ;;  %s4654_s9 = inlined_call_operand.<no memory space> [shape: f32[1], index: 9, kind: input, shape index: {}]   ;;  %s4655_s10 = inlined_call_operand.hbm [shape: f32[2,8,128], index: 10, kind: output, shape index: {}]  }
   0x1   :  { %15 = sst [smem:[#allocation2]] %s4654_s9 }
   0x2   :  { %16 = vsyncpa [#allocation4], 0 }
   0x3   :  { %18 = vsyncpa [#allocation4 + $0x1], 0  ;;  %s3203_s15 = smov 0   ;;  %s3205_s16 = smov 0  }
   0x4   :  { %s3207_s17 = smov 0   ;;  %s3209_s18 = smov 0  }
   0x5 LB: > { %s3224_s9 = sadd.s32 4294967295, %s3140_s18   ;;  %s2541_s19 = sadd.s32 4294967294, %s3140_s18   ;;  %s3140_s18 = sphi %s3209_s18, %s4745_s18   ;;  %s3136_s17 = sphi %s3207_s17, %s4744_s17   ;;  %s3132_s16 = sphi %s3205_s16, %s4743_s16   ;;  %s3128_s15 = sphi %s3203_s15, %s4742_s15  }
   0x6   : > { %s3228_s20 = sadd.s32 1, %s3140_s18   ;;  %s256_s21 = sadd.s32 1, %s3136_s17 }
   0x7   : > { %s253_s22 = ssub.s32 %s3140_s18, %s3228_s20  ;;  %p266_p0 = scmp.ne.s32.totalorder %s3136_s17, %s3132_s16 }
   0x8   : > { %p254_p1 = scmp.eq.s32.totalorder %s253_s22, 0  ;;  %p267_p2 = scmp.eq.s32.totalorder %s3224_s9, 1 }
   0x9   : > { %p272_p3 = scmp.ne.s32.totalorder %s3132_s16, %s3128_s15  ;;  %p273_p4 = scmp.eq.s32.totalorder %s2541_s19, 1 }
   0xa   : > { %s3239_s23 = scalar_select %p254_p1, %s3136_s17, %s256_s21  }
   0xb   : > { %p3241_p5 = por %p267_p2, %p266_p0  ;;  %p3245_p6 = por %p273_p4, %p272_p3 }
   0xc   : > { %p2544_p7 = scmp.ge.s32.totalorder %s3140_s18, 1  ;;  %p337_p8 = scmp.lt.s32.totalorder %s3140_s18, 3 }
   0xe   : > { %p338_p9 = pnand %p2544_p7, %p337_p8 }
  0x10   : > { %341 = sbr.rel (%p338_p9) target bundleno = 1058 (0x422), region = 60 }
  0x17   : > { %v433_v0 = vld [vmem:[%s4648_s3] sm:$0xf]  ;;  %vm492_vm0 = vcmask 1043456   ;;  %p396_p10 = scmp.lt.s32.totalorder %s3224_s9, 1  ;;  %v3142_v1 = vmov 0.0   ;;  %vm3143_vm1 = vmmov 0   ;;  %v730_v42 = vlaneseq }
  0x18   : > { %2728 = vmatprep.subr.mxu1 %v3142_v1  ;;  %2730 = vmatprep.mubr.msk.f32.mxu1 %vm3143_vm1, %v3142_v1  ;;  %s2546_s28 = sshll.u32 %s3224_s9, 4  ;;  %v434_v2 = vld [vmem:[%s4649_s4] sm:$0xff]  ;;  %vm443_vm2 = vcmask 31744   ;;  %vm806_vm3 = vcmask 64512   ;;  %v436_v37 = vld [vmem:[%s4651_s6 + $0x8] sm:$0xff]  ;;  %v437_v39 = vld [vmem:[%s4651_s6 + $0x10] sm:$0xff] }
  0x19   : > { %2729 = vmatpush3.msk.msra.mxu1 %vm492_vm0, %v433_v0  ;;  %2702 = vmatprep.subr.msk.mxu0 %vm492_vm0, %v433_v0  ;;  %s397_s11 = scalar_select %p396_p10, %s3224_s9, 1  ;;  %v435_v36 = vld [vmem:[%s4651_s6] sm:$0xff]  ;;  %v438_v40 = vld [vmem:[%s4651_s6 + $0x18] sm:$0xff]  ;;  %v3352_v45 = vshrl.u32 %v730_v42, 7  ;;  %vm1070_vm5 = vcmask 261120   ;;  %vm2282_vm10 = vcmask 7168  }
  0x1a   : > { %2703 = vmatpush3.msk.msra.mxu0 %vm492_vm0, %v433_v0  ;;  %p385_p11 = scmp.lt.s32.totalorder %s2546_s28, 31  ;;  %2733 = vmatprep.subr.mxu1 %v434_v2  ;;  %v2823_v38 = vpack.c.bf16 %v436_v37, %v435_v36  ;;  %v2827_v41 = vpack.c.bf16 %v438_v40, %v437_v39  ;;  %v3357_v46 = vld [vmem:[%s4650_s5] ss:$0 sm:$0xff]  ;;  %s442_s13 = sld [smem:[#allocation2]] }
  0x1b   : > { %s2550_s12 = sshll.u32 %s397_s11, 3  ;;  %4667 = vst [vmem:[#allocation6_spill] sm:$0xff] %v3352_v45  ;;  %vm732_vm4 = vcmp.lt.s32.totalorder %v3352_v45, 1  ;;  %vm764_vm6 = vcmp.eq.s32.totalorder %v3352_v45, 0  ;;  %s2621_s14 = sshll.u32 %s3224_s9, 7 }
  0x1c   : > { %s399_s19 = scalar_lea.vmem %s4647_s2, %s2550_s12  ;;  %s4747_s28 = smov (!%p385_p11, %s2546_s28), 31  ;;  %2824 = vmatprep.subr.bf16.mxu0 %v2823_v38 }
  0x1d   : > { %v432_v3 = vld [vmem:[%s399_s19] sm:$0xff]  ;;  %s2547_s21 = sshll.u32 %s4747_s28, 3  ;;  %s381_s19 = sand.u32 1, %s3132_s16  }
  0x1e   : > { %2731 = vmatmul.mubr.msk.f32.vlgmr.msra.gmra.mrb[0].mxu1 %vm443_vm2, %v432_v3  ;;  %s3267_s27 = scalar_lea.vmem %s4645_s0, %s2547_s21  ;;  %s3272_s11 = scalar_lea.vmem %s4646_s1, %s2547_s21 }
  0x1f   : > { %2734 = vmatpush3.msra.mxu1 %v434_v2  ;;  %v400_v4 = vld [vmem:[%s3267_s27] sm:$0xff]  ;;  %v401_v5 = vld [vmem:[%s3267_s27 + $0x8] sm:$0xff]  ;;  %v402_v8 = vld [vmem:[%s3267_s27 + $0x10] sm:$0xff]  ;;  %s2545_s21 = sshll.u32 %s381_s19, 3  ;;  %s4601_s12 = scalar_lea.hbm %s4655_s10, %s2621_s14 }
  0x20   : > { %v416_v6 = vld [vmem:[%s3272_s11] sm:$0xff]  ;;  %2704 = vmatprep.mubr.msk.f32.mxu0 %vm443_vm2, %v400_v4  ;;  %v417_v7 = vld [vmem:[%s3272_s11 + $0x8] sm:$0xff]  ;;  %v418_v9 = vld [vmem:[%s3272_s11 + $0x10] sm:$0xff]  ;;  %2832 = vmatprep.subr.bf16.mxu1 %v2823_v38  ;;  %s383_s29 = scalar_lea.vmem [#allocation3], %s2545_s21  ;;  %s3144_s9 = smov [#allocation3]  }
  0x21   : > { %2735 = vmatprep.mubr.msk.f32.mxu1 %vm806_vm3, %v416_v6  ;;  %2705 = vmatmul.mubr.msk.f32.vlgmr.msra.gmra.mrb[0].mxu0 %vm443_vm2, %v401_v5  ;;  %v403_v10 = vld [vmem:[%s3267_s27 + $0x18] sm:$0xff]  ;;  %v404_v12 = vld [vmem:[%s3267_s27 + $0x20] sm:$0xff]  ;;  %v405_v14 = vld [vmem:[%s3267_s27 + $0x28] sm:$0xff]  ;;  %s2458_s30 = sshll.u32 %s383_s29, 4  ;;  %s4603_s30 = int_to_ptr.vmem [resolvable:$true] %s2458_s30 }
  0x22   : > { %2736 = vmatmul.mubr.msk.f32.vlgmr.msra.gmra.mrb[2].mxu1 %vm806_vm3, %v417_v7  ;;  %2707 = vmatprep.mubr.msk.f32.mxu0 %vm443_vm2, %v402_v8  ;;  %v419_v11 = vld [vmem:[%s3272_s11 + $0x18] sm:$0xff]  ;;  %v420_v13 = vld [vmem:[%s3272_s11 + $0x20] sm:$0xff]  ;;  %v421_v15 = vld [vmem:[%s3272_s11 + $0x28] sm:$0xff]  ;;  %s3078_s21 = scalar_lea.vmem %s4603_s30, 128 }
  0x23   : > { %2738 = vmatprep.mubr.msk.f32.mxu1 %vm806_vm3, %v418_v9  ;;  %v406_v16 = vld [vmem:[%s3267_s27 + $0x30] sm:$0xff]  ;;  %v407_v18 = vld [vmem:[%s3267_s27 + $0x38] sm:$0xff]  ;;  %v408_v20 = vld [vmem:[%s3267_s27 + $0x40] sm:$0xff]  ;;  %2826 = vmatpush3.bf16.msra.mxu0 %v2823_v38  ;;  %p3079_p12 = scmp.ne.s32.totalorder %s4603_s30, %s3078_s21 }
  0x24   : > { %v422_v17 = vld [vmem:[%s3272_s11 + $0x30] sm:$0xff]  ;;  %v423_v19 = vld [vmem:[%s3272_s11 + $0x38] sm:$0xff]  ;;  %v424_v21 = vld [vmem:[%s3272_s11 + $0x40] sm:$0xff]  ;;  %2834 = vmatpush3.bf16.msra.mxu1 %v2823_v38  ;;  %2828 = vmatprep.subr.bf16.mxu0 %v2827_v41 }
  0x25   : > { %2708 = vmatmul.mubr.msk.f32.gmra.mrb[2].mxu0 %vm443_vm2, %v403_v10  ;;  %v409_v22 = vld [vmem:[%s3267_s27 + $0x48] sm:$0xff]  ;;  %v410_v24 = vld [vmem:[%s3267_s27 + $0x50] sm:$0xff]  ;;  %v411_v26 = vld [vmem:[%s3267_s27 + $0x58] sm:$0xff]  ;;  %2836 = vmatprep.subr.bf16.mxu1 %v2827_v41  ;;  %p3080_p13 = pnand %p3079_p12, %p3241_p5 }
  0x26   : > { %2739 = vmatmul.mubr.msk.f32.gmra.mrb[4].mxu1 %vm806_vm3, %v419_v11  ;;  %2710 = vmatprep.mubr.msk.f32.mxu0 %vm443_vm2, %v404_v12  ;;  %v425_v23 = vld [vmem:[%s3272_s11 + $0x48] sm:$0xff]  ;;  %v426_v25 = vld [vmem:[%s3272_s11 + $0x50] sm:$0xff]  ;;  %v427_v27 = vld [vmem:[%s3272_s11 + $0x58] sm:$0xff] }
  0x27   : > { %2741 = vmatprep.mubr.msk.f32.mxu1 %vm806_vm3, %v420_v13  ;;  %v412_v28 = vld [vmem:[%s3267_s27 + $0x60] sm:$0xff]  ;;  %v413_v30 = vld [vmem:[%s3267_s27 + $0x68] sm:$0xff]  ;;  %v414_v32 = vld [vmem:[%s3267_s27 + $0x70] sm:$0xff]  ;;  %2830 = vmatpush3.bf16.msra.mxu0 %v2827_v41  ;;  %p3081_p0 = pneg %p3080_p13 }
  0x28   : > { %v428_v29 = vld [vmem:[%s3272_s11 + $0x60] sm:$0xff]  ;;  %v429_v31 = vld [vmem:[%s3272_s11 + $0x68] sm:$0xff]  ;;  %v430_v33 = vld [vmem:[%s3272_s11 + $0x70] sm:$0xff]  ;;  %2838 = vmatpush3.bf16.msra.mxu1 %v2827_v41 }
  0x29   : > { %2711 = vmatmul.mubr.msk.f32.gmra.mrb[4].mxu0 %vm443_vm2, %v405_v14  ;;  %v415_v34 = vld [vmem:[%s3267_s27 + $0x78] sm:$0xff] }
  0x2a   : > { %2742 = vmatmul.mubr.msk.f32.gmra.mrb[6].mxu1 %vm806_vm3, %v421_v15  ;;  %2713 = vmatprep.mubr.msk.f32.mxu0 %vm443_vm2, %v406_v16  ;;  %v431_v35 = vld [vmem:[%s3272_s11 + $0x78] sm:$0xff] }
  0x2b   : > { %2744 = vmatprep.mubr.msk.f32.mxu1 %vm806_vm3, %v422_v17 }
  0x2d   : > { %2714 = vmatmul.mubr.msk.f32.gmra.mrb[6].mxu0 %vm443_vm2, %v407_v18 }
  0x2e   : > { %2745 = vmatmul.mubr.msk.f32.gmra.mrb[8].mxu1 %vm806_vm3, %v423_v19  ;;  %2716 = vmatprep.mubr.msk.f32.mxu0 %vm443_vm2, %v408_v20 }
  0x2f   : > { %2747 = vmatprep.mubr.msk.f32.mxu1 %vm806_vm3, %v424_v21 }
  0x31   : > { %2717 = vmatmul.mubr.msk.f32.gmra.mrb[8].mxu0 %vm443_vm2, %v409_v22 }
  0x32   : > { %2748 = vmatmul.mubr.msk.f32.gmra.mrb[10].mxu1 %vm806_vm3, %v425_v23  ;;  %2719 = vmatprep.mubr.msk.f32.mxu0 %vm443_vm2, %v410_v24 }
  0x33   : > { %2750 = vmatprep.mubr.msk.f32.mxu1 %vm806_vm3, %v426_v25 }
  0x35   : > { %2720 = vmatmul.mubr.msk.f32.gmra.mrb[10].mxu0 %vm443_vm2, %v411_v26 }
  0x36   : > { %2751 = vmatmul.mubr.msk.f32.gmra.mrb[12].mxu1 %vm806_vm3, %v427_v27  ;;  %2722 = vmatprep.mubr.msk.f32.mxu0 %vm443_vm2, %v412_v28 }
  0x37   : > { %2753 = vmatprep.mubr.msk.f32.mxu1 %vm806_vm3, %v428_v29 }
  0x39   : > { %2723 = vmatmul.mubr.msk.f32.gmra.mrb[12].mxu0 %vm443_vm2, %v413_v30 }
  0x3a   : > { %2754 = vmatmul.mubr.msk.f32.gmra.mrb[14].mxu1 %vm806_vm3, %v429_v31  ;;  %2725 = vmatprep.mubr.msk.f32.mxu0 %vm443_vm2, %v414_v32 }
  0x3b   : > { %2756 = vmatprep.mubr.msk.f32.mxu1 %vm806_vm3, %v430_v33 }
  0x3d   : > { %2726 = vmatmul.mubr.msk.f32.gmra.mrb[14].mxu0 %vm443_vm2, %v415_v34 }
  0x3e   : > { %2757 = vmatmul.mubr.msk.f32.gmra.mrb[16].mxu1 %vm806_vm3, %v431_v35 }
  0xf1   : > { %v3350_v43 = vpop.f32.mrb[0].mxu1 }
  0xf2   : > { %v2732_v44 = vpop.f32.mrb[1].mxu1 }
  0xf4   : > { %v2706_v47 = vpop.f32.mrb[0].mxu0 }
  0xf5   : > { %v2737_v48 = vpop.f32.mrb[2].mxu1  ;;  %v715_v49 = vrot.slane %v2706_v47, 7  ;;  %v3359_v50 = vpop.f32.mrb[1].mxu0 }
  0xf6   : > { %v927_v51 = vadd.f32 %v2737_v48, %v3357_v46  ;;  %v921_v52 = vpop.f32.mrb[3].mxu1  ;;  %v714_v53 = vrot.slane %v3359_v50, 7 }
  0xf7   : > { %v3365_v54 = vadd.f32 %v3357_v46, %v921_v52 }
  0xf8   : > { %v1001_v55 = vadd.f32 %v2706_v47, %v927_v51  ;;  %v747_v56 = vsel %vm732_vm4, %v714_v53, %v715_v49  ;;  %v2709_v58 = vpop.f32.mrb[2].mxu0 }
  0xf9   : > { %v1000_v57 = vadd.f32 %v3365_v54, %v3359_v50  ;;  %v2740_v59 = vpop.f32.mrb[4].mxu1  ;;  %v3373_v60 = vadd.f32 %v927_v51, %v747_v56  ;;  %v717_v61 = vrot.slane %v2709_v58, 7  ;;  %v572_v62 = vpop.f32.mrb[3].mxu0 }
  0xfa   : > { %v937_v63 = vadd.f32 %v2740_v59, %v3357_v46  ;;  %v931_v0 = vpop.f32.mrb[5].mxu1  ;;  %v716_v2 = vrot.slane %v572_v62, 7  ;;  %v1017_v4 = vmax.f32 %v1001_v55, 0.0 }
  0xfb   : > { %v1016_v1 = vmax.f32 %v1000_v57, 0.0  ;;  %v932_v3 = vadd.f32 %v3357_v46, %v931_v0 }
  0xfc   : > { %v1003_v5 = vadd.f32 %v2709_v58, %v937_v63  ;;  %v745_v6 = vsel %vm732_vm4, %v716_v2, %v717_v61  ;;  %v746_v7 = vsel %vm732_vm4, %v715_v49, %v716_v2  ;;  %v2712_v9 = vpop.f32.mrb[4].mxu0 }
  0xfd   : > { %v1002_v8 = vadd.f32 %v932_v3, %v572_v62  ;;  %v2743_v10 = vpop.f32.mrb[6].mxu1  ;;  %2767 = vmatprep.mubr.msk.f32.mxu0 %vm1070_vm5, %v1016_v1  ;;  %v3382_v11 = vadd.f32 %v937_v63, %v745_v6  ;;  %v3384_v12 = vadd.f32 %v932_v3, %v746_v7  ;;  %v719_v13 = vrot.slane %v2712_v9, 7  ;;  %v582_v14 = vpop.f32.mrb[5].mxu0 }
  0xfe   : > { %v941_v15 = vpop.f32.mrb[7].mxu1  ;;  %2768 = vmatmul.mubr.msk.f32.vlgmr.msra.gmra.mrb[16].mxu0 %vm1070_vm5, %v1017_v4  ;;  %v718_v17 = vrot.slane %v582_v14, 7  ;;  %v947_v18 = vadd.f32 %v2743_v10, %v3357_v46  ;;  %v1019_v20 = vmax.f32 %v1003_v5, 0.0 }
  0xff   : > { %v1018_v16 = vmax.f32 %v1002_v8, 0.0  ;;  %v942_v19 = vadd.f32 %v3357_v46, %v941_v15 }
 0x100   : > { %v743_v21 = vsel %vm732_vm4, %v718_v17, %v719_v13  ;;  %v1005_v22 = vadd.f32 %v2712_v9, %v947_v18  ;;  %v744_v23 = vsel %vm732_vm4, %v717_v61, %v718_v17  ;;  %v2715_v25 = vpop.f32.mrb[6].mxu0 }
 0x101   : > { %v1004_v24 = vadd.f32 %v942_v19, %v582_v14  ;;  %v2746_v26 = vpop.f32.mrb[8].mxu1  ;;  %2770 = vmatprep.mubr.msk.f32.mxu0 %vm1070_vm5, %v1018_v16  ;;  %v3394_v27 = vadd.f32 %v947_v18, %v743_v21  ;;  %v3396_v28 = vadd.f32 %v942_v19, %v744_v23  ;;  %v721_v29 = vrot.slane %v2715_v25, 7  ;;  %v592_v30 = vpop.f32.mrb[7].mxu0 }
 0x102   : > { %v957_v31 = vadd.f32 %v2746_v26, %v3357_v46  ;;  %v951_v32 = vpop.f32.mrb[9].mxu1  ;;  %2771 = vmatmul.mubr.msk.f32.gmra.mrb[18].mxu0 %vm1070_vm5, %v1019_v20  ;;  %v720_v34 = vrot.slane %v592_v30, 7  ;;  %v1021_v36 = vmax.f32 %v1005_v22, 0.0  ;;  %v782_v20 = vsub.s32 0, %v3352_v45 }
 0x103   : > { %v1020_v33 = vmax.f32 %v1004_v24, 0.0  ;;  %v952_v35 = vadd.f32 %v3357_v46, %v951_v32 }
 0x104   : > { %v1007_v37 = vadd.f32 %v2715_v25, %v957_v31  ;;  %v741_v38 = vsel %vm732_vm4, %v720_v34, %v721_v29  ;;  %v742_v39 = vsel %vm732_vm4, %v719_v13, %v720_v34  ;;  %v2718_v41 = vpop.f32.mrb[8].mxu0 }
 0x105   : > { %v1006_v40 = vadd.f32 %v952_v35, %v592_v30  ;;  %v2749_v42 = vpop.f32.mrb[10].mxu1  ;;  %2773 = vmatprep.mubr.msk.f32.mxu0 %vm1070_vm5, %v1020_v33  ;;  %v3406_v44 = vadd.f32 %v957_v31, %v741_v38  ;;  %v3408_v47 = vadd.f32 %v952_v35, %v742_v39  ;;  %v723_v48 = vrot.slane %v2718_v41, 7  ;;  %v602_v49 = vpop.f32.mrb[9].mxu0 }
 0x106   : > { %v961_v51 = vpop.f32.mrb[11].mxu1  ;;  %2774 = vmatmul.mubr.msk.f32.gmra.mrb[20].mxu0 %vm1070_vm5, %v1021_v36  ;;  %v722_v55 = vrot.slane %v602_v49, 7  ;;  %v967_v56 = vadd.f32 %v2749_v42, %v3357_v46  ;;  %v1023_v58 = vmax.f32 %v1007_v37, 0.0 }
 0x107   : > { %v1022_v52 = vmax.f32 %v1006_v40, 0.0  ;;  %v962_v57 = vadd.f32 %v3357_v46, %v961_v51  ;;  %v783_v51 = vrot.slane %v3350_v43, %v782_v20 }
 0x108   : > { %v739_v59 = vsel %vm732_vm4, %v722_v55, %v723_v48  ;;  %v1009_v61 = vadd.f32 %v2718_v41, %v967_v56  ;;  %v740_v62 = vsel %vm732_vm4, %v721_v29, %v722_v55  ;;  %v2721_v0 = vpop.f32.mrb[10].mxu0 }
 0x109   : > { %v1008_v63 = vadd.f32 %v962_v57, %v602_v49  ;;  %v2752_v1 = vpop.f32.mrb[12].mxu1  ;;  %2776 = vmatprep.mubr.msk.f32.mxu0 %vm1070_vm5, %v1022_v52  ;;  %v3418_v2 = vadd.f32 %v967_v56, %v739_v59  ;;  %v3420_v3 = vadd.f32 %v962_v57, %v740_v62  ;;  %v725_v4 = vrot.slane %v2721_v0, 7  ;;  %v612_v5 = vpop.f32.mrb[11].mxu0 }
 0x10a   : > { %v977_v6 = vadd.f32 %v2752_v1, %v3357_v46  ;;  %v971_v7 = vpop.f32.mrb[13].mxu1  ;;  %2777 = vmatmul.mubr.msk.f32.gmra.mrb[22].mxu0 %vm1070_vm5, %v1023_v58  ;;  %v724_v9 = vrot.slane %v612_v5, 7  ;;  %v1025_v13 = vmax.f32 %v1009_v61, 0.0 }
 0x10b   : > { %v1024_v8 = vmax.f32 %v1008_v63, 0.0  ;;  %v972_v10 = vadd.f32 %v3357_v46, %v971_v7  ;;  %v1051_v7 = vmax.f32 %v3382_v11, 0.0  ;;  %v1057_v11 = vmax.f32 %v3418_v2, 0.0 }
 0x10c   : > { %v1011_v14 = vadd.f32 %v2721_v0, %v977_v6  ;;  %v737_v15 = vsel %vm732_vm4, %v724_v9, %v725_v4  ;;  %v738_v16 = vsel %vm732_vm4, %v723_v48, %v724_v9  ;;  %v2724_v18 = vpop.f32.mrb[12].mxu0  ;;  %v1056_v9 = vmax.f32 %v3420_v3, 0.0 }
 0x10d   : > { %v1010_v17 = vadd.f32 %v972_v10, %v612_v5  ;;  %v2755_v19 = vpop.f32.mrb[14].mxu1  ;;  %2779 = vmatprep.mubr.msk.f32.mxu0 %vm1070_vm5, %v1024_v8  ;;  %v3431_v21 = vadd.f32 %v977_v6, %v737_v15  ;;  %v3433_v22 = vadd.f32 %v972_v10, %v738_v16  ;;  %v727_v23 = vrot.slane %v2724_v18, 7  ;;  %v622_v24 = vpop.f32.mrb[13].mxu0  ;;  %v3493_v10 = vld [vmem:[%s4652_s7] ss:$0 sm:$0xff] }
 0x10e   : > { %v981_v25 = vpop.f32.mrb[15].mxu1  ;;  %2780 = vmatmul.mubr.msk.f32.gmra.mrb[24].mxu0 %vm1070_vm5, %v1025_v13  ;;  %v726_v29 = vrot.slane %v622_v24, 7  ;;  %v987_v30 = vadd.f32 %v2755_v19, %v3357_v46  ;;  %v1027_v32 = vmax.f32 %v1011_v14, 0.0  ;;  %v1049_v5 = vmax.f32 %v3373_v60, 0.0 }
 0x10f   : > { %v1026_v26 = vmax.f32 %v1010_v17, 0.0  ;;  %v982_v31 = vadd.f32 %v3357_v46, %v981_v25  ;;  %v1050_v6 = vmax.f32 %v3384_v12, 0.0  ;;  %v1053_v60 = vmax.f32 %v3394_v27, 0.0  ;;  %v3500_v17 = vld [vmem:[%s4653_s8] ss:$0 sm:$0xff] }
 0x110   : > { %v735_v33 = vsel %vm732_vm4, %v726_v29, %v727_v23  ;;  %v1013_v34 = vadd.f32 %v2724_v18, %v987_v30  ;;  %v736_v35 = vsel %vm732_vm4, %v725_v4, %v726_v29  ;;  %v2727_v37 = vpop.f32.mrb[14].mxu0  ;;  %v1054_v12 = vmax.f32 %v3408_v47, 0.0 }
 0x111   : > { %v1012_v36 = vadd.f32 %v982_v31, %v622_v24  ;;  %v2758_v38 = vpop.f32.mrb[16].mxu1  ;;  %2782 = vmatprep.mubr.msk.f32.mxu0 %vm1070_vm5, %v1026_v26  ;;  %v1045_v39 = vadd.f32 %v987_v30, %v735_v33  ;;  %v1044_v40 = vadd.f32 %v982_v31, %v736_v35  ;;  %v729_v41 = vrot.slane %v2727_v37, 7  ;;  %v632_v42 = vpop.f32.mrb[15].mxu0 }
 0x112   : > { %v997_v48 = vadd.f32 %v2758_v38, %v3357_v46  ;;  %v991_v49 = vpop.f32.mrb[17].mxu1  ;;  %2783 = vmatmul.mubr.msk.f32.gmra.mrb[26].mxu0 %vm1070_vm5, %v1027_v32  ;;  %v728_v55 = vrot.slane %v632_v42, 7  ;;  %v1029_v57 = vmax.f32 %v1013_v34, 0.0  ;;  %v1055_v8 = vmax.f32 %v3406_v44, 0.0 }
 0x113   : > { %v1028_v52 = vmax.f32 %v1012_v36, 0.0  ;;  %v992_v56 = vadd.f32 %v3357_v46, %v991_v49  ;;  %v748_v58 = vsel %vm732_vm4, %v729_v41, %v714_v53  ;;  %v1059_v27 = vmax.f32 %v3431_v21, 0.0 }
 0x114   : > { %v1015_v59 = vadd.f32 %v2727_v37, %v997_v48  ;;  %v784_v61 = vsel %vm764_vm6, %v783_v51, %v748_v58  ;;  %v733_v62 = vsel %vm732_vm4, %v728_v55, %v729_v41  ;;  %v734_v43 = vsel %vm732_vm4, %v727_v23, %v728_v55 }
 0x115   : > { %v1014_v63 = vadd.f32 %v992_v56, %v632_v42  ;;  %2785 = vmatprep.mubr.msk.f32.mxu0 %vm1070_vm5, %v1028_v52  ;;  %v1047_v46 = vadd.f32 %v997_v48, %v733_v62  ;;  %v1046_v0 = vadd.f32 %v992_v56, %v734_v43  ;;  %v1032_v50 = vadd.f32 %v3365_v54, %v784_v61 }
 0x116   : > { %2786 = vmatmul.mubr.msk.f32.gmra.mrb[28].mxu0 %vm1070_vm5, %v1029_v57  ;;  %v1031_v1 = vmax.f32 %v1015_v59, 0.0  ;;  %v1052_v54 = vmax.f32 %v3396_v28, 0.0  ;;  %v1058_v28 = vmax.f32 %v3433_v22, 0.0  ;;  %v1060_v47 = vmax.f32 %v1044_v40, 0.0 }
 0x117   : > { %v1030_v53 = vmax.f32 %v1014_v63, 0.0  ;;  %v1048_v4 = vmax.f32 %v1032_v50, 0.0  ;;  %v1061_v44 = vmax.f32 %v1045_v39, 0.0  ;;  %v1062_v3 = vmax.f32 %v1046_v0, 0.0 }
 0x118   : > { %v1063_v2 = vmax.f32 %v1047_v46, 0.0 }
 0x119   : > { %2788 = vmatprep.mubr.msk.f32.mxu0 %vm1070_vm5, %v1030_v53  ;;  %2799 = vmatprep.mubr.msk.f32.mxu1 %vm1070_vm5, %v1048_v4 }
 0x11a   : > { %2789 = vmatmul.mubr.msk.f32.gmra.mrb[30].mxu0 %vm1070_vm5, %v1031_v1  ;;  %2800 = vmatmul.mubr.msk.f32.vlgmr.msra.gmra.mrb[18].mxu1 %vm1070_vm5, %v1049_v5 }
 0x11b   : > { %2802 = vmatprep.mubr.msk.f32.mxu1 %vm1070_vm5, %v1050_v6 }
 0x11e   : > { %2803 = vmatmul.mubr.msk.f32.gmra.mrb[20].mxu1 %vm1070_vm5, %v1051_v7 }
 0x11f   : > { %2805 = vmatprep.mubr.msk.f32.mxu1 %vm1070_vm5, %v1052_v54 }
 0x122   : > { %2806 = vmatmul.mubr.msk.f32.gmra.mrb[22].mxu1 %vm1070_vm5, %v1053_v60 }
 0x123   : > { %2808 = vmatprep.mubr.msk.f32.mxu1 %vm1070_vm5, %v1054_v12 }
 0x126   : > { %2809 = vmatmul.mubr.msk.f32.gmra.mrb[24].mxu1 %vm1070_vm5, %v1055_v8 }
 0x127   : > { %2811 = vmatprep.mubr.msk.f32.mxu1 %vm1070_vm5, %v1056_v9 }
 0x12a   : > { %2812 = vmatmul.mubr.msk.f32.gmra.mrb[26].mxu1 %vm1070_vm5, %v1057_v11 }
 0x12b   : > { %2814 = vmatprep.mubr.msk.f32.mxu1 %vm1070_vm5, %v1058_v28 }
 0x12e   : > { %2815 = vmatmul.mubr.msk.f32.gmra.mrb[28].mxu1 %vm1070_vm5, %v1059_v27 }
 0x12f   : > { %2817 = vmatprep.mubr.msk.f32.mxu1 %vm1070_vm5, %v1060_v47 }
 0x132   : > { %2818 = vmatmul.mubr.msk.f32.gmra.mrb[30].mxu1 %vm1070_vm5, %v1061_v44 }
 0x133   : > { %2820 = vmatprep.mubr.msk.f32.mxu1 %vm1070_vm5, %v1062_v3 }
 0x136   : > { %2821 = vmatmul.mubr.msk.f32.gmra.mrb[32].mxu1 %vm1070_vm5, %v1063_v2 }
 0x1d1   : > { %v2769_v13 = vpop.f32.mrb[16].mxu0 }
 0x1d2   : > { %v1191_v14 = vadd.f32 %v2769_v13, %v3493_v10  ;;  %v1185_v15 = vpop.f32.mrb[17].mxu0 }
 0x1d3   : > { %v1186_v16 = vadd.f32 %v3493_v10, %v1185_v15 }
 0x1d4   : > { %v1265_v18 = vmax.f32 %v1191_v14, 0.0 }
 0x1d5   : > { %v1264_v19 = vmax.f32 %v1186_v16, 0.0  ;;  %v2772_v20 = vpop.f32.mrb[18].mxu0 }
 0x1d6   : > { %v1201_v21 = vadd.f32 %v2772_v20, %v3493_v10  ;;  %v1195_v22 = vpop.f32.mrb[19].mxu0  ;;  %v1496_v23 = vmul.f32 %v3500_v17, %v1265_v18 }
 0x1d7   : > { %v1196_v25 = vadd.f32 %v3493_v10, %v1195_v22  ;;  %v1495_v29 = vmul.f32 %v3500_v17, %v1264_v19 }
 0x1d8   : > { %v1267_v24 = vmax.f32 %v1201_v21, 0.0  ;;  %v1514_v26 = vsel %vm1070_vm5, %v1496_v23, 0.0 }
 0x1d9   : > { %1515 = vadd.xlane.f32.xlu1 %v1514_v26  ;;  %v2775_v30 = vpop.f32.mrb[20].mxu0  ;;  %v1266_v32 = vmax.f32 %v1196_v25, 0.0  ;;  %v1511_v34 = vsel %vm1070_vm5, %v1495_v29, 0.0 }
 0x1da   : > { %v1205_v31 = vpop.f32.mrb[21].mxu0  ;;  %v1211_v33 = vadd.f32 %v2775_v30, %v3493_v10  ;;  %v1498_v35 = vmul.f32 %v3500_v17, %v1267_v24 }
 0x1db   : > { %v1206_v39 = vadd.f32 %v3493_v10, %v1205_v31  ;;  %v1497_v41 = vmul.f32 %v3500_v17, %v1266_v32 }
 0x1dc   : > { %v1269_v38 = vmax.f32 %v1211_v33, 0.0  ;;  %v1520_v40 = vsel %vm1070_vm5, %v1498_v35, 0.0 }
 0x1dd   : > { %v2778_v36 = vpop.f32.mrb[22].mxu0  ;;  %1512 = vadd.xlane.f32.xlu1 %v1511_v34  ;;  %v1268_v49 = vmax.f32 %v1206_v39, 0.0  ;;  %v1517_v52 = vsel %vm1070_vm5, %v1497_v41, 0.0 }
 0x1de   : > { %v1215_v37 = vpop.f32.mrb[23].mxu0  ;;  %v1221_v51 = vadd.f32 %v2778_v36, %v3493_v10  ;;  %v1500_v55 = vmul.f32 %v3500_v17, %v1269_v38 }
 0x1df   : > { %v1216_v59 = vadd.f32 %v3493_v10, %v1215_v37  ;;  %v1499_v62 = vmul.f32 %v3500_v17, %v1268_v49 }
 0x1e0   : > { %v1271_v58 = vmax.f32 %v1221_v51, 0.0  ;;  %v1526_v61 = vsel %vm1070_vm5, %v1500_v55, 0.0 }
 0x1e1   : > { %v2781_v42 = vpop.f32.mrb[24].mxu0  ;;  %1521 = vadd.xlane.f32.xlu1 %v1520_v40  ;;  %v1270_v46 = vmax.f32 %v1216_v59, 0.0  ;;  %v1523_v50 = vsel %vm1070_vm5, %v1499_v62, 0.0 }
 0x1e2   : > { %v1225_v48 = vpop.f32.mrb[25].mxu0  ;;  %v1231_v0 = vadd.f32 %v2781_v42, %v3493_v10  ;;  %v1502_v53 = vmul.f32 %v3500_v17, %v1271_v58 }
 0x1e3   : > { %v1226_v6 = vadd.f32 %v3493_v10, %v1225_v48  ;;  %v1501_v9 = vmul.f32 %v3500_v17, %v1270_v46 }
 0x1e4   : > { %v1273_v60 = vmax.f32 %v1231_v0, 0.0  ;;  %v1532_v8 = vsel %vm1070_vm5, %v1502_v53, 0.0 }
 0x1e5   : > { %v2784_v56 = vpop.f32.mrb[26].mxu0  ;;  %1518 = vadd.xlane.f32.xlu1 %v1517_v52  ;;  %v1272_v2 = vmax.f32 %v1226_v6, 0.0  ;;  %v1529_v14 = vsel %vm1070_vm5, %v1501_v9, 0.0 }
 0x1e6   : > { %v1235_v57 = vpop.f32.mrb[27].mxu0  ;;  %v1241_v13 = vadd.f32 %v2784_v56, %v3493_v10  ;;  %v1504_v15 = vmul.f32 %v3500_v17, %v1273_v60 }
 0x1e7   : > { %v1236_v22 = vadd.f32 %v3493_v10, %v1235_v57  ;;  %v1503_v26 = vmul.f32 %v3500_v17, %v1272_v2 }
 0x1e8   : > { %v1275_v24 = vmax.f32 %v1241_v13, 0.0  ;;  %v1538_v25 = vsel %vm1070_vm5, %v1504_v15, 0.0 }
 0x1e9   : > { %v2787_v43 = vpop.f32.mrb[28].mxu0  ;;  %1527 = vadd.xlane.f32.xlu1 %v1526_v61  ;;  %v1274_v34 = vmax.f32 %v1236_v22, 0.0  ;;  %v1535_v37 = vsel %vm1070_vm5, %v1503_v26, 0.0 }
 0x1ea   : > { %v1245_v63 = vpop.f32.mrb[29].mxu0  ;;  %v1251_v35 = vadd.f32 %v2787_v43, %v3493_v10  ;;  %v1506_v38 = vmul.f32 %v3500_v17, %v1275_v24 }
 0x1eb   : > { %v1246_v51 = vadd.f32 %v3493_v10, %v1245_v63  ;;  %v1505_v55 = vmul.f32 %v3500_v17, %v1274_v34 }
 0x1ec   : > { %v1277_v49 = vmax.f32 %v1251_v35, 0.0  ;;  %v1544_v57 = vsel %vm1070_vm5, %v1506_v38, 0.0 }
 0x1ed   : > { %1524 = vadd.xlane.f32.xlu1 %v1523_v50  ;;  %v3522_v1 = vpop.f32.mrb[30].mxu0  ;;  %v2801_v4 = vpop.f32.mrb[18].mxu1  ;;  %v1276_v0 = vmax.f32 %v1246_v51, 0.0  ;;  %v1541_v53 = vsel %vm1070_vm5, %v1505_v55, 0.0 }
 0x1ee   : > { %v3524_v5 = vpop.f32.mrb[31].mxu0  ;;  %v1400_v7 = vadd.f32 %v2801_v4, %v3493_v10  ;;  %v1394_v54 = vpop.f32.mrb[19].mxu1  ;;  %v1508_v4 = vmul.f32 %v3500_v17, %v1277_v49 }
 0x1ef   : > { %v1395_v12 = vadd.f32 %v3493_v10, %v1394_v54  ;;  %v1256_v6 = vadd.f32 %v3493_v10, %v3524_v5  ;;  %v1507_v2 = vmul.f32 %v3500_v17, %v1276_v0 }
 0x1f0   : > { %v1474_v11 = vmax.f32 %v1400_v7, 0.0 }
 0x1f1   : > { %1533 = vadd.xlane.f32.xlu1 %v1532_v8  ;;  %v1473_v28 = vmax.f32 %v1395_v12, 0.0  ;;  %v2804_v27 = vpop.f32.mrb[20].mxu1 }
 0x1f2   : > { %v1410_v47 = vadd.f32 %v2804_v27, %v3493_v10  ;;  %v1404_v44 = vpop.f32.mrb[21].mxu1  ;;  %v1577_v3 = vmul.f32 %v3500_v17, %v1474_v11 }
 0x1f3   : > { %v1405_v18 = vadd.f32 %v3493_v10, %v1404_v44  ;;  %v1576_v20 = vmul.f32 %v3500_v17, %v1473_v28  ;;  %v1261_v28 = vadd.f32 %v3522_v1, %v3493_v10 }
 0x1f4   : > { %v1476_v16 = vmax.f32 %v1410_v47, 0.0  ;;  %v1595_v19 = vsel %vm1070_vm5, %v1577_v3, 0.0  ;;  %v1550_v3 = vsel %vm1070_vm5, %v1508_v4, 0.0 }
 0x1f5   : > { %1530 = vadd.xlane.f32.xlu1 %v1529_v14  ;;  %1596 = vadd.xlane.f32.xlu0 %v1595_v19  ;;  %v2807_v21 = vpop.f32.mrb[22].mxu1  ;;  %v1475_v29 = vmax.f32 %v1405_v18, 0.0  ;;  %v1592_v31 = vsel %vm1070_vm5, %v1576_v20, 0.0  ;;  %v1278_v14 = vmax.f32 %v1256_v6, 0.0  ;;  %v1279_v24 = vmax.f32 %v1261_v28, 0.0 }
 0x1f6   : > { %v1414_v23 = vpop.f32.mrb[23].mxu1  ;;  %v1420_v30 = vadd.f32 %v2807_v21, %v3493_v10  ;;  %v1579_v32 = vmul.f32 %v3500_v17, %v1476_v16 }
 0x1f7   : > { %v1415_v40 = vadd.f32 %v3493_v10, %v1414_v23  ;;  %v1578_v42 = vmul.f32 %v3500_v17, %v1475_v29 }
 0x1f8   : > { %v1478_v39 = vmax.f32 %v1420_v30, 0.0  ;;  %v1601_v41 = vsel %vm1070_vm5, %v1579_v32, 0.0  ;;  %v1509_v32 = vmul.f32 %v3500_v17, %v1278_v14 }
 0x1f9   : > { %1539 = vadd.xlane.f32.xlu1 %v1538_v25  ;;  %v2810_v33 = vpop.f32.mrb[24].mxu1  ;;  %1593 = vadd.xlane.f32.xlu0 %v1592_v31  ;;  %v1477_v58 = vmax.f32 %v1415_v40, 0.0  ;;  %v1598_v61 = vsel %vm1070_vm5, %v1578_v42, 0.0  ;;  %v1547_v31 = vsel %vm1070_vm5, %v1507_v2, 0.0 }
 0x1fa   : > { %v1424_v36 = vpop.f32.mrb[25].mxu1  ;;  %v1430_v59 = vadd.f32 %v2810_v33, %v3493_v10  ;;  %v1581_v62 = vmul.f32 %v3500_v17, %v1478_v39  ;;  %v1553_v40 = vsel %vm1070_vm5, %v1509_v32, 0.0 }
 0x1fb   : > { %v1425_v7 = vadd.f32 %v3493_v10, %v1424_v36  ;;  %v1580_v11 = vmul.f32 %v3500_v17, %v1477_v58 }
 0x1fc   : > { %v1480_v12 = vmax.f32 %v1430_v59, 0.0  ;;  %v1607_v9 = vsel %vm1070_vm5, %v1581_v62, 0.0 }
 0x1fd   : > { %1536 = vadd.xlane.f32.xlu1 %v1535_v37  ;;  %v2813_v48 = vpop.f32.mrb[26].mxu1  ;;  %1602 = vadd.xlane.f32.xlu0 %v1601_v41  ;;  %v1479_v15 = vmax.f32 %v1425_v7, 0.0  ;;  %v1604_v20 = vsel %vm1070_vm5, %v1580_v11, 0.0 }
 0x1fe   : > { %v1434_v52 = vpop.f32.mrb[27].mxu1  ;;  %v1440_v1 = vadd.f32 %v2813_v48, %v3493_v10  ;;  %v1583_v21 = vmul.f32 %v3500_v17, %v1480_v12 }
 0x1ff   : > { %v1435_v56 = vadd.f32 %v3493_v10, %v1434_v52  ;;  %v1582_v37 = vmul.f32 %v3500_v17, %v1479_v15 }
 0x200   : > { %v1482_v34 = vmax.f32 %v1440_v1, 0.0  ;;  %v1613_v36 = vsel %vm1070_vm5, %v1583_v21, 0.0  ;;  %v3637_v21 = vstv %s2621_s14 }
 0x201   : > { %1545 = vadd.xlane.f32.xlu1 %v1544_v57  ;;  %v1481_v43 = vmax.f32 %v1435_v56, 0.0  ;;  %v2816_v46 = vpop.f32.mrb[28].mxu1  ;;  %1599 = vadd.xlane.f32.xlu0 %v1598_v61  ;;  %v1610_v42 = vsel %vm1070_vm5, %v1582_v37, 0.0  ;;  %v3602_v61 = vstv %s442_s13  ;;  %4668 = vst [vmem:[#allocation7_spill] sm:$0xff] %v3637_v21  ;;  %v752_v37 = vadd.s32 32, %v3352_v45  ;;  %s2445_s13 = scalar_lea.sflag [#allocation4], %s381_s19 }
 0x202   : > { %v1450_v63 = vadd.f32 %v2816_v46, %v3493_v10  ;;  %v1444_v50 = vpop.f32.mrb[29].mxu1  ;;  %v1585_v48 = vmul.f32 %v3500_v17, %v1482_v34 }
 0x203   : > { %v1445_v54 = vadd.f32 %v3493_v10, %v1444_v50  ;;  %v1584_v60 = vmul.f32 %v3500_v17, %v1481_v43 }
 0x204   : > { %v1484_v8 = vmax.f32 %v1450_v63, 0.0  ;;  %v1619_v51 = vsel %vm1070_vm5, %v1585_v48, 0.0 }
 0x205   : > { %1542 = vadd.xlane.f32.xlu1 %v1541_v53  ;;  %v1483_v27 = vmax.f32 %v1445_v54, 0.0  ;;  %v2819_v47 = vpop.f32.mrb[30].mxu1  ;;  %1608 = vadd.xlane.f32.xlu0 %v1607_v9  ;;  %v1616_v52 = vsel %vm1070_vm5, %v1584_v60, 0.0 }
 0x206   : > { %v1460_v5 = vadd.f32 %v2819_v47, %v3493_v10  ;;  %v1454_v44 = vpop.f32.mrb[31].mxu1  ;;  %v1587_v13 = vmul.f32 %v3500_v17, %v1484_v8 }
 0x207   : > { %v1455_v16 = vadd.f32 %v3493_v10, %v1454_v44  ;;  %v1586_v18 = vmul.f32 %v3500_v17, %v1483_v27 }
 0x208   : > { %v1486_v19 = vmax.f32 %v1460_v5, 0.0  ;;  %v1625_v55 = vsel %vm1070_vm5, %v1587_v13, 0.0 }
 0x209   : > { %1551 = vadd.xlane.f32.xlu1 %v1550_v3  ;;  %v1485_v22 = vmax.f32 %v1455_v16, 0.0  ;;  %1605 = vadd.xlane.f32.xlu0 %v1604_v20  ;;  %v2822_v23 = vpop.f32.mrb[32].mxu1  ;;  %v1622_v56 = vsel %vm1070_vm5, %v1586_v18, 0.0 }
 0x20a   : > { %v1470_v25 = vadd.f32 %v2822_v23, %v3493_v10  ;;  %v1464_v26 = vpop.f32.mrb[33].mxu1  ;;  %v1589_v29 = vmul.f32 %v3500_v17, %v1486_v19  ;;  %v749_v19 = vadd.s32 8, %v3352_v45  ;;  %v751_v23 = vadd.s32 24, %v3352_v45 }
 0x20b   : > { %v1465_v30 = vadd.f32 %v3493_v10, %v1464_v26  ;;  %v1588_v33 = vmul.f32 %v3500_v17, %v1485_v22  ;;  %v1510_v10 = vmul.f32 %v3500_v17, %v1279_v24  ;;  %v750_v24 = vadd.s32 16, %v3352_v45 }
 0x20c   : > { %v1488_v35 = vmax.f32 %v1470_v25, 0.0  ;;  %v1631_v57 = vsel %vm1070_vm5, %v1589_v29, 0.0  ;;  %v753_v26 = vadd.s32 40, %v3352_v45 }
 0x20d   : > { %1548 = vadd.xlane.f32.xlu1 %v1547_v31  ;;  %v1487_v38 = vmax.f32 %v1465_v30, 0.0  ;;  %1614 = vadd.xlane.f32.xlu0 %v1613_v36  ;;  %v1556_v49 = vsel %vm1070_vm5, %v1510_v10, 0.0  ;;  %v3654_v36 = vadd.s32 %v3637_v21, %v3352_v45 }
 0x20e   : > { %v1591_v39 = vmul.f32 %v3500_v17, %v1488_v35  ;;  %v3650_v35 = vadd.s32 %v3637_v21, %v749_v19  ;;  %v3664_v10 = vadd.s32 %v3637_v21, %v753_v26 }
 0x20f   : > { %v1590_v41 = vmul.f32 %v3500_v17, %v1487_v38  ;;  %v1628_v17 = vsel %vm1070_vm5, %v1588_v33, 0.0  ;;  %vm2250_vm8 = vcmp.lt.s32.totalorder %v3654_v36, 200 }
 0x210   : > { %v1637_v59 = vsel %vm1070_vm5, %v1591_v39, 0.0  ;;  %v3658_v39 = vadd.s32 %v3637_v21, %v751_v23  ;;  %vm2251_vm7 = vcmp.lt.s32.totalorder %v3650_v35, 200  ;;  %vm2255_vm3 = vcmp.lt.s32.totalorder %v3664_v10, 200 }
 0x211   : > { %1554 = vadd.xlane.f32.xlu1 %v1553_v40  ;;  %1611 = vadd.xlane.f32.xlu0 %v1610_v42  ;;  %v1634_v58 = vsel %vm1070_vm5, %v1590_v41, 0.0  ;;  %v3661_v40 = vadd.s32 %v3637_v21, %v750_v24 }
 0x212   : > { %vm2253_vm12 = vcmp.lt.s32.totalorder %v3658_v39, 200 }
 0x213   : > { %vm2252_vm15 = vcmp.lt.s32.totalorder %v3661_v40, 200 }
 0x215   : > { %1557 = vadd.xlane.f32.xlu1 %v1556_v49  ;;  %1620 = vadd.xlane.f32.xlu0 %v1619_v51 }
 0x219   : > { %1617 = vadd.xlane.f32.xlu0 %v1616_v52  ;;  %v755_v52 = vadd.s32 56, %v3352_v45 }
 0x21d   : > { %1626 = vadd.xlane.f32.xlu0 %v1625_v55  ;;  %v754_v55 = vadd.s32 48, %v3352_v45 }
 0x221   : > { %1623 = vadd.xlane.f32.xlu0 %v1622_v56 }
 0x225   : > { %1632 = vadd.xlane.f32.xlu0 %v1631_v57 }
 0x229   : > { %1629 = vadd.xlane.f32.xlu0 %v1628_v17  ;;  %v3678_v17 = vadd.s32 %v3637_v21, %v752_v37 }
 0x22b   : > { %vm2254_vm2 = vcmp.lt.s32.totalorder %v3678_v17, 200 }
 0x22d   : > { %1635 = vadd.xlane.f32.xlu0 %v1634_v58  ;;  %v757_v58 = vadd.s32 72, %v3352_v45 }
 0x231   : > { %1638 = vadd.xlane.f32.xlu0 %v1637_v59  ;;  %v756_v59 = vadd.s32 64, %v3352_v45 }
 0x266   : > { %v1516_v62 = vpop.xlane.xlu1 %1515 }
 0x267   : > { %v3605_v43 = vadd.f32 %v3602_v61, %v1516_v62 }
 0x269   : > { %v1673_v46 = vand.u32 2147483647, %v3605_v43 }
 0x26a   : > { %v1513_v0 = vpop.xlane.xlu1 %1512 }
 0x26b   : > { %v1689_v63 = vsub.f32 0.0, %v1673_v46  ;;  %v3609_v50 = vadd.f32 %v3602_v61, %v1513_v0 }
 0x26d   : > { %v1706_v53 = vmul.f32 1.442695, %v1689_v63  ;;  %v1672_v4 = vand.u32 2147483647, %v3609_v50  ;;  %v759_v63 = vadd.s32 88, %v3352_v45 }
 0x26e   : > { %v1522_v6 = vpop.xlane.xlu1 %1521 }
 0x26f   : > { %2886 = vpow2.f32 %v1706_v53  ;;  %v1688_v7 = vsub.f32 0.0, %v1672_v4  ;;  %v3613_v54 = vadd.f32 %v3602_v61, %v1522_v6  ;;  %v758_v53 = vadd.s32 80, %v3352_v45 }
 0x271   : > { %v1704_v60 = vmul.f32 1.442695, %v1688_v7  ;;  %v1675_v12 = vand.u32 2147483647, %v3613_v54  ;;  %v761_v7 = vadd.s32 104, %v3352_v45  ;;  %v3709_v19 = vadd.s32 %v3637_v21, %v758_v53 }
 0x272   : > { %v1519_v8 = vpop.xlane.xlu1 %1518 }
 0x273   : > { %2888 = vpow2.f32 %v1704_v60  ;;  %v1691_v9 = vsub.f32 0.0, %v1675_v12  ;;  %v3617_v11 = vadd.f32 %v3602_v61, %v1519_v8  ;;  %v3690_v12 = vadd.s32 %v3637_v21, %v755_v52 }
 0x274   : > { %v3712_v24 = vadd.s32 %v3637_v21, %v761_v7 }
 0x275   : > { %v1710_v28 = vmul.f32 1.442695, %v1691_v9  ;;  %v1674_v27 = vand.u32 2147483647, %v3617_v11  ;;  %v3695_v9 = vadd.s32 %v3637_v21, %v754_v55  ;;  %v1658_v7 = vmin.f32 %v3617_v11, 0.0 }
 0x276   : > { %v1528_v47 = vpop.xlane.xlu1 %1527 }
 0x277   : > { %2890 = vpow2.f32 %v1710_v28  ;;  %v1690_v5 = vsub.f32 0.0, %v1674_v27  ;;  %v3621_v44 = vadd.f32 %v3602_v61, %v1528_v47 }
 0x279   : > { %v3623_v3 = vpop.eup %2886  ;;  %v1708_v2 = vmul.f32 1.442695, %v1690_v5  ;;  %v1677_v13 = vand.u32 2147483647, %v3621_v44  ;;  %v3699_v5 = vadd.s32 %v3637_v21, %v757_v58 }
 0x27a   : > { %v1525_v14 = vpop.xlane.xlu1 %1524  ;;  %v1745_v15 = vadd.f32 1.0, %v3623_v3  ;;  %v1748_v57 = vmul.f32 -0.5, %v3623_v3 }
 0x27b   : > { %v3629_v16 = vadd.f32 %v3602_v61, %v1525_v14  ;;  %v1693_v18 = vsub.f32 0.0, %v1677_v13  ;;  %2892 = vpow2.f32 %v1708_v2  ;;  %v3702_v2 = vadd.s32 %v3637_v21, %v756_v59 }
 0x27c   : > { %2894 = vlog2.f32 %v1745_v15  ;;  %v1749_v27 = vadd.f32 1.0, %v1748_v57  ;;  %v1751_v14 = vand.u32 2147483647, %v3623_v3  ;;  %v1659_v57 = vmin.f32 %v3613_v54, 0.0 }
 0x27d   : > { %v3631_v1 = vpop.eup %2888  ;;  %v1676_v20 = vand.u32 2147483647, %v3629_v16  ;;  %v1714_v31 = vmul.f32 1.442695, %v1693_v18  ;;  %v3706_v18 = vadd.s32 %v3637_v21, %v759_v63 }
 0x27e   : > { %v1736_v22 = vadd.f32 1.0, %v3631_v1  ;;  %v1534_v25 = vpop.xlane.xlu1 %1533  ;;  %v1739_v4 = vmul.f32 -0.5, %v3631_v1  ;;  %vm3724_vm9 = vcmp.lt.f32.partialorder %v1751_v14, 0.0004427343 }
 0x27f   : > { %v1692_v29 = vsub.f32 0.0, %v1676_v20  ;;  %v3644_v30 = vadd.f32 %v3602_v61, %v1534_v25  ;;  %v1742_v25 = vand.u32 2147483647, %v3631_v1 }
 0x280   : > { %2896 = vlog2.f32 %v1736_v22  ;;  %v1740_v22 = vadd.f32 1.0, %v1739_v4 }
 0x281   : > { %v3646_v32 = vpop.eup %2890  ;;  %v1712_v33 = vmul.f32 1.442695, %v1692_v29  ;;  %v1679_v34 = vand.u32 2147483647, %v3644_v30  ;;  %2898 = vpow2.f32 %v1714_v31  ;;  %v760_v29 = vadd.s32 96, %v3352_v45 }
 0x282   : > { %v1531_v38 = vpop.xlane.xlu1 %1530  ;;  %v1597_v41 = vpop.xlane.xlu0 %1596  ;;  %v1763_v48 = vadd.f32 1.0, %v3646_v32  ;;  %v1741_v52 = vmul.f32 %v3631_v1, %v1740_v22  ;;  %vm3737_vm11 = vcmp.lt.f32.partialorder %v1742_v25, 0.0004427343 }
 0x283   : > { %v3667_v42 = vadd.f32 %v3602_v61, %v1531_v38  ;;  %v1695_v49 = vsub.f32 0.0, %v1679_v34  ;;  %v3671_v51 = vadd.f32 %v1597_v41, %v3602_v61  ;;  %2900 = vpow2.f32 %v1712_v33 }
 0x284   : > { %2902 = vlog2.f32 %v1763_v48  ;;  %v1657_v33 = vmin.f32 %v3605_v43, 0.0  ;;  %v1750_v34 = vmul.f32 %v3623_v3, %v1749_v27  ;;  %v1766_v48 = vmul.f32 -0.5, %v3646_v32 }
 0x285   : > { %v1678_v56 = vand.u32 2147483647, %v3667_v42  ;;  %v3682_v62 = vpop.eup %2892  ;;  %v1897_v46 = vsub.f32 0.0, %v3671_v51  ;;  %v1718_v6 = vmul.f32 1.442695, %v1695_v49  ;;  %v1656_v3 = vmin.f32 %v3609_v50, 0.0 }
 0x286   : > { %v2895_v60 = vpop.eup %2894  ;;  %v1754_v47 = vadd.f32 1.0, %v3682_v62  ;;  %v1594_v23 = vpop.xlane.xlu0 %1593  ;;  %v1757_v55 = vmul.f32 -0.5, %v3682_v62  ;;  %v3744_v59 = vadd.s32 %v3637_v21, %v760_v29  ;;  %v1769_v50 = vand.u32 2147483647, %v3646_v32 }
 0x287   : > { %v1694_v0 = vsub.f32 0.0, %v1678_v56  ;;  %v1929_v8 = vand.u32 2147483647, %v1897_v46  ;;  %v1747_v20 = vmul.f32 0.6931472, %v2895_v60  ;;  %2904 = vpow2.f32 %v1718_v6 }
 0x288   : > { %v3730_v49 = vadd.f32 %v1594_v23, %v3602_v61  ;;  %v1760_v1 = vand.u32 2147483647, %v3682_v62  ;;  %v1767_v6 = vadd.f32 1.0, %v1766_v48  ;;  %v1758_v60 = vadd.f32 1.0, %v1757_v55 }
 0x289   : > { %v1716_v28 = vmul.f32 1.442695, %v1694_v0  ;;  %v1945_v15 = vsub.f32 0.0, %v1929_v8  ;;  %v1753_v43 = vsel %vm3724_vm9, %v1750_v34, %v1747_v20  ;;  %v1661_v8 = vmin.f32 %v3621_v44, 0.0 }
 0x28a   : > { %v2897_v13 = vpop.eup %2896  ;;  %v1881_v4 = vsub.f32 %v1657_v33, %v1753_v43  ;;  %v1896_v54 = vsub.f32 0.0, %v3730_v49  ;;  %vm3760_vm13 = vcmp.lt.f32.partialorder %v1769_v50, 0.0004427343  ;;  %vm3764_vm14 = vcmp.lt.f32.partialorder %v1760_v1, 0.0004427343 }
 0x28b   : > { %v1962_v26 = vmul.f32 1.442695, %v1945_v15  ;;  %2906 = vpow2.f32 %v1716_v28  ;;  %v3717_v31 = vpop.eup %2898  ;;  %v1738_v37 = vmul.f32 0.6931472, %v2897_v13  ;;  %v1660_v28 = vmin.f32 %v3629_v16, 0.0 }
 0x28c   : > { %2908 = vlog2.f32 %v1754_v47  ;;  %v1781_v58 = vadd.f32 1.0, %v3717_v31  ;;  %v1784_v14 = vmul.f32 -0.5, %v3717_v31  ;;  %v1662_v23 = vmin.f32 %v3667_v42, 0.0 }
 0x28d   : > { %v3722_v38 = vpop.eup %2900  ;;  %2910 = vpow2.f32 %v1962_v26  ;;  %v1744_v63 = vsel %vm3737_vm11, %v1741_v52, %v1738_v37  ;;  %v2154_v26 = vmul.f32 1.442695, %v1881_v4  ;;  %v1768_v29 = vmul.f32 %v3646_v32, %v1767_v6  ;;  %v1540_v37 = vpop.xlane.xlu1 %1539 }
 0x28e   : > { %v2903_v0 = vpop.eup %2902  ;;  %v1772_v53 = vadd.f32 1.0, %v3722_v38  ;;  %v1880_v47 = vsub.f32 %v1656_v3, %v1744_v63  ;;  %2912 = vlog2.f32 %v1781_v58  ;;  %v3774_v33 = vmin.f32 %v1897_v46, 0.0 }
 0x28f   : > { %v1765_v13 = vmul.f32 0.6931472, %v2903_v0  ;;  %v1928_v34 = vand.u32 2147483647, %v1896_v54  ;;  %v2267_v48 = vsel %vm2251_vm7, %v1881_v4, 0.0  ;;  %v1759_v43 = vmul.f32 %v3682_v62, %v1758_v60 }
 0x290   : > { %2914 = vlog2.f32 %v1772_v53  ;;  %v1787_v3 = vand.u32 2147483647, %v3717_v31  ;;  %v1775_v52 = vmul.f32 -0.5, %v3722_v38  ;;  %v2152_v32 = vmul.f32 1.442695, %v1880_v47 }
 0x291   : > { %v3757_v15 = vpop.eup %2904  ;;  %v2266_v51 = vsel %vm2250_vm8, %v1880_v47, 0.0  ;;  %v1771_v46 = vsel %vm3760_vm13, %v1768_v29, %v1765_v13  ;;  %v1785_v56 = vadd.f32 1.0, %v1784_v14  ;;  %v1778_v58 = vand.u32 2147483647, %v3722_v38  ;;  %v1603_v47 = vpop.xlane.xlu0 %1602 }
 0x292   : > { %v1944_v63 = vsub.f32 0.0, %v1928_v34  ;;  %2916 = vpow2.f32 %v2154_v26  ;;  %v2284_v50 = vsel %vm2282_vm10, %v2267_v48, 0.0  ;;  %v1799_v53 = vadd.f32 1.0, %v3757_v15  ;;  %v1537_v26 = vpop.xlane.xlu1 %1536 }
 0x293   : > { %v2283_v4 = vsel %vm2282_vm10, %v2266_v51, 0.0  ;;  %v1883_v6 = vsub.f32 %v1659_v57, %v1771_v46  ;;  %v1776_v60 = vadd.f32 1.0, %v1775_v52  ;;  %v1786_v13 = vmul.f32 %v3717_v31, %v1785_v56 }
 0x294   : > { %vm3797_vm0 = vcmp.lt.f32.partialorder %v1787_v3, 0.0004427343  ;;  %v1802_v20 = vmul.f32 -0.5, %v3757_v15  ;;  %vm3802_vm1 = vcmp.lt.f32.partialorder %v1778_v58, 0.0004427343  ;;  %v3807_v57 = vadd.f32 %v3602_v61, %v1540_v37 }
 0x295   : > { %v3769_v25 = vpop.eup %2906  ;;  %v1960_v34 = vmul.f32 1.442695, %v1944_v63  ;;  %v3809_v48 = vadd.f32 %v2284_v50, %v2283_v4  ;;  %v3814_v3 = vadd.f32 %v1603_v47, %v3602_v61  ;;  %v1777_v51 = vmul.f32 %v3722_v38, %v1776_v60  ;;  %v1600_v4 = vpop.xlane.xlu0 %1599 }
 0x296   : > { %v2909_v41 = vpop.eup %2908  ;;  %v1790_v62 = vadd.f32 1.0, %v3769_v25  ;;  %v3818_v46 = vadd.f32 %v3602_v61, %v1537_v26  ;;  %v2269_v37 = vsel %vm2253_vm12, %v1883_v6, 0.0  ;;  %v1803_v56 = vadd.f32 1.0, %v1802_v20 }
 0x297   : > { %v3783_v55 = vpop.eup %2910  ;;  %v1756_v1 = vmul.f32 0.6931472, %v2909_v41  ;;  %v1681_v58 = vand.u32 2147483647, %v3807_v57  ;;  %v4656_v22 = vsub.f32 0.0, %v3814_v3  ;;  %v3829_v38 = vmin.f32 %v1896_v54, 0.0 }
 0x298   : > { %v2001_v0 = vadd.f32 1.0, %v3783_v55  ;;  %v2913_v41 = vpop.eup %2912  ;;  %v2004_v50 = vmul.f32 -0.5, %v3783_v55  ;;  %v3836_v11 = vsel %vm2282_vm10, %v2269_v37, 0.0  ;;  %v1793_v49 = vmul.f32 -0.5, %v3769_v25 }
 0x299   : > { %v1762_v31 = vsel %vm3764_vm14, %v1759_v43, %v1756_v1  ;;  %v1697_v1 = vsub.f32 0.0, %v1681_v58  ;;  %v1796_v60 = vand.u32 2147483647, %v3769_v25  ;;  %v1546_v58 = vpop.xlane.xlu1 %1545  ;;  %vm2256_vm9 = vcmp.lt.s32.totalorder %v3695_v9, 200 }
 0x29a   : > { %2918 = vlog2.f32 %v2001_v0  ;;  %v2915_v52 = vpop.eup %2914  ;;  %v1882_v43 = vsub.f32 %v1658_v7, %v1762_v31  ;;  %v1783_v0 = vmul.f32 0.6931472, %v2913_v41  ;;  %v1680_v7 = vand.u32 2147483647, %v3818_v46 }
 0x29b   : > { %2920 = vpow2.f32 %v2152_v32  ;;  %v2158_v32 = vmul.f32 1.442695, %v1883_v6  ;;  %v1774_v63 = vmul.f32 0.6931472, %v2915_v52  ;;  %v3844_v6 = vmul.f32 %v3757_v15, %v1803_v56 }
 0x29c   : > { %2922 = vlog2.f32 %v1790_v62  ;;  %v1805_v62 = vand.u32 2147483647, %v3757_v15  ;;  %v3841_v54 = vpop.eup %2916  ;;  %v1722_v47 = vmul.f32 1.442695, %v1697_v1  ;;  %v1789_v41 = vsel %vm3797_vm0, %v1786_v13, %v1783_v0 }
 0x29d   : > { %2924 = vlog2.f32 %v1799_v53  ;;  %v1931_v53 = vand.u32 2147483647, %v4656_v22  ;;  %v1696_v31 = vsub.f32 0.0, %v1680_v7  ;;  %v3852_v52 = vadd.f32 %v1600_v4, %v3602_v61 }
 0x29e   : > { %2926 = vpow2.f32 %v1960_v34  ;;  %v2268_v34 = vsel %vm2252_vm15, %v1882_v43, 0.0  ;;  %v1780_v15 = vsel %vm3802_vm1, %v1777_v51, %v1774_v63  ;;  %v2005_v37 = vadd.f32 1.0, %v2004_v50  ;;  %v1609_v63 = vpop.xlane.xlu0 %1608 }
 0x29f   : > { %2928 = vpow2.f32 %v2158_v32  ;;  %v1947_v20 = vsub.f32 0.0, %v1931_v53  ;;  %v2007_v53 = vand.u32 2147483647, %v3783_v55  ;;  %v1794_v22 = vadd.f32 1.0, %v1793_v49 }
 0x2a0   : > { %2930 = vpow2.f32 %v1722_v47  ;;  %v1720_v27 = vmul.f32 1.442695, %v1696_v31  ;;  %v1898_v13 = vsub.f32 0.0, %v3852_v52  ;;  %v2286_v0 = vsel %vm2282_vm10, %v2268_v34, 0.0 }
 0x2a1   : > { %v1966_v56 = vmul.f32 1.442695, %v1947_v20  ;;  %v1885_v4 = vsub.f32 %v1661_v8, %v1789_v41  ;;  %vm3863_vm4 = vcmp.lt.f32.partialorder %v1805_v62, 0.0004427343  ;;  %v2156_v7 = vmul.f32 1.442695, %v1882_v43 }
 0x2a2   : > { %v1884_v49 = vsub.f32 %v1660_v28, %v1780_v15  ;;  %vm3871_vm5 = vcmp.lt.f32.partialorder %v1796_v60, 0.0004427343  ;;  %v3876_v44 = vadd.f32 %v3602_v61, %v1546_v58  ;;  %v2006_v8 = vmul.f32 %v3783_v55, %v2005_v37  ;;  %v1606_v58 = vpop.xlane.xlu0 %1605 }
 0x2a3   : > { %2932 = vpow2.f32 %v1966_v56  ;;  %v2287_v43 = vadd.f32 %v2286_v0, %v3809_v48  ;;  %vm3882_vm11 = vcmp.lt.f32.partialorder %v2007_v53, 0.0004427343  ;;  %v1795_v28 = vmul.f32 %v3769_v25, %v1794_v22  ;;  %v1543_v25 = vpop.xlane.xlu1 %1542 }
 0x2a4   : > { %v2919_v26 = vpop.eup %2918  ;;  %2934 = vpow2.f32 %v1720_v27  ;;  %v1930_v60 = vand.u32 2147483647, %v1898_v13  ;;  %v2270_v27 = vsel %vm2254_vm2, %v1884_v49, 0.0  ;;  %v1683_v31 = vand.u32 2147483647, %v3876_v44 }
 0x2a5   : > { %v3854_v32 = vpop.eup %2920  ;;  %v2003_v51 = vmul.f32 0.6931472, %v2919_v26  ;;  %v2162_v26 = vmul.f32 1.442695, %v1885_v4  ;;  %v3897_v15 = vadd.f32 %v1609_v63, %v3602_v61  ;;  %v2271_v22 = vsel %vm2255_vm3, %v1885_v4, 0.0 }
 0x2a6   : > { %v2923_v1 = vpop.eup %2922  ;;  %v1946_v48 = vsub.f32 0.0, %v1930_v60  ;;  %v2160_v37 = vmul.f32 1.442695, %v1884_v49  ;;  %vm2257_vm13 = vcmp.lt.s32.totalorder %v3690_v12, 200  ;;  %v2289_v63 = vadd.f32 %v3836_v11, %v2287_v43 }
 0x2a7   : > { %v2925_v14 = vpop.eup %2924  ;;  %v1792_v62 = vmul.f32 0.6931472, %v2923_v1  ;;  %v2009_v55 = vsel %vm3882_vm11, %v2006_v8, %v2003_v51  ;;  %v4658_v0 = vsub.f32 0.0, %v3897_v15  ;;  %v2290_v4 = vsel %vm2282_vm10, %v2270_v27, 0.0 }
 0x2a8   : > { %v3867_v50 = vpop.eup %2926  ;;  %v1801_v34 = vmul.f32 0.6931472, %v2925_v14  ;;  %v3905_v1 = vsub.f32 %v3774_v33, %v2009_v55  ;;  %v1964_v53 = vmul.f32 1.442695, %v1946_v48  ;;  %v1699_v14 = vsub.f32 0.0, %v1683_v31 }
 0x2a9   : > { %v1992_v20 = vadd.f32 1.0, %v3867_v50  ;;  %v3891_v41 = vpop.eup %2928  ;;  %v1798_v56 = vsel %vm3871_vm5, %v1795_v28, %v1792_v62  ;;  %v3921_v47 = vadd.f32 %v1606_v58, %v3602_v61  ;;  %v1995_v11 = vmul.f32 -0.5, %v3867_v50 }
 0x2aa   : > { %v3908_v51 = vpop.eup %2930  ;;  %v1807_v49 = vsel %vm3863_vm4, %v3844_v6, %v1801_v34  ;;  %v1886_v33 = vsub.f32 %v1662_v23, %v1798_v56  ;;  %v1933_v43 = vand.u32 2147483647, %v4658_v0  ;;  %v2292_v29 = vsel %vm2282_vm10, %v2271_v22, 0.0 }
 0x2ab   : > { %2936 = vlog2.f32 %v1992_v20  ;;  %v1817_v62 = vadd.f32 1.0, %v3908_v51  ;;  %v1726_v20 = vmul.f32 1.442695, %v1699_v14  ;;  %v2186_v42 = vmul.f32 1.442695, %v3905_v1 }
 0x2ac   : > { %2938 = vpow2.f32 %v2156_v7  ;;  %v3913_v7 = vadd.f32 %v3602_v61, %v1543_v25  ;;  %v1949_v28 = vsub.f32 0.0, %v1933_v43  ;;  %v4687_v34 = vmin.f32 %v3644_v30, 0.0 }
 0x2ad   : > { %2940 = vpow2.f32 %v2162_v26  ;;  %v3923_v8 = vpop.eup %2932  ;;  %v2291_v26 = vadd.f32 %v2290_v4, %v2289_v63  ;;  %v2272_v27 = vsel %vm2256_vm9, %v1886_v33, 0.0  ;;  %v4657_v48 = vsub.f32 0.0, %v3921_v47 }
 0x2ae   : > { %2942 = vpow2.f32 %v1964_v53  ;;  %v3932_v6 = vpop.eup %2934  ;;  %v2019_v16 = vadd.f32 1.0, %v3923_v8  ;;  %v1682_v60 = vand.u32 2147483647, %v3913_v7  ;;  %v1887_v55 = vsub.f32 %v4687_v34, %v1807_v49 }
 0x2af   : > { %2944 = vpow2.f32 %v2160_v37  ;;  %v1996_v25 = vadd.f32 1.0, %v1995_v11  ;;  %v1808_v37 = vadd.f32 1.0, %v3932_v6  ;;  %v1998_v56 = vand.u32 2147483647, %v3867_v50  ;;  %v1552_v11 = vpop.xlane.xlu1 %1551 }
 0x2b0   : > { %2946 = vpow2.f32 %v1726_v20  ;;  %v4688_v58 = vsub.f32 0.0, %v3814_v3  ;;  %v1970_v30 = vmul.f32 1.442695, %v1949_v28  ;;  %v2294_v63 = vsel %vm2282_vm10, %v2272_v27, 0.0 }
 0x2b1   : > { %2948 = vlog2.f32 %v1817_v62  ;;  %v1698_v49 = vsub.f32 0.0, %v1682_v60  ;;  %v2166_v62 = vmul.f32 1.442695, %v1887_v55  ;;  %v2293_v20 = vadd.f32 %v2292_v29, %v2291_v26 }
 0x2b2   : > { %2950 = vpow2.f32 %v2186_v42  ;;  %v3946_v53 = vmin.f32 %v4688_v58, 0.0  ;;  %v1932_v43 = vand.u32 2147483647, %v4657_v48  ;;  %v2273_v3 = vsel %vm2257_vm13, %v1887_v55, 0.0 }
 0x2b3   : > { %2952 = vlog2.f32 %v2019_v16  ;;  %v2164_v28 = vmul.f32 1.442695, %v1886_v33  ;;  %v1997_v34 = vmul.f32 %v3867_v50, %v1996_v25  ;;  %v2295_v16 = vadd.f32 %v2294_v63, %v2293_v20 }
 0x2b4   : > { %2954 = vpow2.f32 %v1970_v30  ;;  %vm3960_vm14 = vcmp.lt.f32.partialorder %v1998_v56, 0.0004427343  ;;  %v1948_v29 = vsub.f32 0.0, %v1932_v43  ;;  %v3965_v26 = vadd.f32 %v3602_v61, %v1552_v11  ;;  %v1615_v11 = vpop.xlane.xlu0 %1614 }
 0x2b5   : > { %v2937_v31 = vpop.eup %2936  ;;  %2956 = vlog2.f32 %v1808_v37  ;;  %v1820_v55 = vmul.f32 -0.5, %v3908_v51  ;;  %v1724_v50 = vmul.f32 1.442695, %v1698_v49  ;;  %v2296_v37 = vsel %vm2282_vm10, %v2273_v3, 0.0 }
 0x2b6   : > { %v3948_v14 = vpop.eup %2938  ;;  %v1994_v4 = vmul.f32 0.6931472, %v2937_v31  ;;  %2958 = vpow2.f32 %v2166_v62  ;;  %v2324_v56 = vsel %vm2251_vm7, %v3905_v1, 0.0  ;;  %v1823_v63 = vand.u32 2147483647, %v3908_v51 }
 0x2b7   : > { %v3953_v42 = vpop.eup %2940  ;;  %2960 = vpow2.f32 %v2164_v28  ;;  %v1968_v49 = vmul.f32 1.442695, %v1948_v29  ;;  %v3986_v20 = vadd.f32 %v2296_v37, %v2295_v16  ;;  %v1685_v1 = vand.u32 2147483647, %v3965_v26 }
 0x2b8   : > { %v3958_v27 = vpop.eup %2942  ;;  %v2000_v31 = vsel %vm3960_vm14, %v1997_v34, %v1994_v4  ;;  %v3983_v4 = vmin.f32 %v1898_v13, 0.0  ;;  %v3990_v3 = vsel %vm2282_vm10, %v2324_v56, 0.0  ;;  %v1821_v28 = vadd.f32 1.0, %v1820_v55 }
 0x2b9   : > { %v2010_v33 = vadd.f32 1.0, %v3958_v27  ;;  %v3971_v25 = vpop.eup %2944  ;;  %v2136_v62 = vsub.f32 %v3829_v38, %v2000_v31  ;;  %v2022_v34 = vmul.f32 -0.5, %v3923_v8  ;;  %v2025_v13 = vand.u32 2147483647, %v3923_v8 }
 0x2ba   : > { %v3978_v30 = vpop.eup %2946  ;;  %v1811_v60 = vmul.f32 -0.5, %v3932_v6  ;;  %v3997_v16 = vadd.f32 %v1615_v11, %v3602_v61  ;;  %vm3999_vm0 = vcmp.lt.f32.partialorder %v1823_v63, 0.0004427343  ;;  %v2013_v55 = vmul.f32 -0.5, %v3958_v27 }
 0x2bb   : > { %2962 = vlog2.f32 %v2010_v33  ;;  %v2949_v43 = vpop.eup %2948  ;;  %v1835_v38 = vadd.f32 1.0, %v3978_v30  ;;  %v2184_v37 = vmul.f32 1.442695, %v2136_v62  ;;  %vm2259_vm1 = vcmp.lt.s32.totalorder %v3699_v5, 200 }
 0x2bc   : > { %2964 = vpow2.f32 %v1724_v50  ;;  %v2951_v52 = vpop.eup %2950  ;;  %v1819_v56 = vmul.f32 0.6931472, %v2949_v43  ;;  %v1701_v11 = vsub.f32 0.0, %v1685_v1  ;;  %v1822_v63 = vmul.f32 %v3908_v51, %v1821_v28 }
 0x2bd   : > { %v2953_v29 = vpop.eup %2952  ;;  %2966 = vpow2.f32 %v1968_v49  ;;  %v2023_v48 = vadd.f32 1.0, %v2022_v34  ;;  %v1814_v23 = vand.u32 2147483647, %v3932_v6  ;;  %v2217_v33 = vsub.f32 %v3841_v54, %v2951_v52 }
 0x2be   : > { %v4005_v50 = vpop.eup %2954  ;;  %vm4013_vm4 = vcmp.lt.f32.partialorder %v2025_v13, 0.0004427343  ;;  %v1812_v21 = vadd.f32 1.0, %v1811_v60  ;;  %2968 = vlog2.f32 %v1835_v38  ;;  %v2021_v43 = vmul.f32 0.6931472, %v2953_v29 }
 0x2bf   : > { %v2957_v22 = vpop.eup %2956  ;;  %v2037_v0 = vadd.f32 1.0, %v4005_v50  ;;  %v2014_v45 = vadd.f32 1.0, %v2013_v55  ;;  %v2016_v1 = vand.u32 2147483647, %v3958_v27  ;;  %v4695_v58 = vsub.f32 0.0, %v3897_v15 }
 0x2c0   : > { %v4022_v28 = vpop.eup %2958  ;;  %2970 = vpow2.f32 %v2184_v37  ;;  %v1825_v54 = vsel %vm3999_vm0, %v1822_v63, %v1819_v56  ;;  %vm2258_vm5 = vcmp.lt.s32.totalorder %v3702_v2, 200  ;;  %v1810_v34 = vmul.f32 0.6931472, %v2957_v22  ;;  %v1549_v63 = vpop.xlane.xlu1 %1548 }
 0x2c1   : > { %v4020_v51 = vmin.f32 %v4695_v58, 0.0  ;;  %v1730_v52 = vmul.f32 1.442695, %v1701_v11  ;;  %v4027_v13 = vpop.eup %2960  ;;  %v2024_v60 = vmul.f32 %v3923_v8, %v2023_v48  ;;  %vm4030_vm11 = vcmp.lt.f32.partialorder %v1814_v23, 0.0004427343 }
 0x2c2   : > { %v1838_v15 = vmul.f32 -0.5, %v3978_v30  ;;  %2972 = vlog2.f32 %v2037_v0  ;;  %v2380_v29 = vsel %vm2251_vm7, %v2217_v33, 0.0  ;;  %v2323_v31 = vsel %vm2250_vm8, %v2136_v62, 0.0 }
 0x2c3   : > { %v1813_v22 = vmul.f32 %v3932_v6, %v1812_v21  ;;  %v1903_v55 = vsub.f32 0.0, %v3997_v16  ;;  %v4698_v8 = vmin.f32 %v3807_v57, 0.0  ;;  %v2027_v48 = vsel %vm4013_vm4, %v2024_v60, %v2021_v43 }
 0x2c4   : > { %v2015_v56 = vmul.f32 %v3958_v27, %v2014_v45  ;;  %vm4050_vm7 = vcmp.lt.f32.partialorder %v2016_v1, 0.0004427343  ;;  %v4701_v21 = vsub.f32 0.0, %v3921_v47  ;;  %2974 = vpow2.f32 %v1730_v52 }
 0x2c5   : > { %v2963_v58 = vpop.eup %2962  ;;  %v1889_v23 = vsub.f32 %v4698_v8, %v1825_v54  ;;  %v1816_v35 = vsel %vm4030_vm11, %v1813_v22, %v1810_v34  ;;  %v4061_v33 = vsel %vm2282_vm10, %v2380_v29, 0.0  ;;  %v1839_v27 = vadd.f32 1.0, %v1838_v15 }
 0x2c6   : > { %v4041_v37 = vpop.eup %2964  ;;  %v2012_v0 = vmul.f32 0.6931472, %v2963_v58  ;;  %v4056_v6 = vmin.f32 %v4701_v21, 0.0  ;;  %v1841_v11 = vand.u32 2147483647, %v3978_v30  ;;  %v2339_v49 = vsel %vm2282_vm10, %v2323_v31, 0.0 }
 0x2c7   : > { %v4058_v57 = vpop.eup %2966  ;;  %v2139_v43 = vsub.f32 %v3946_v53, %v2027_v48  ;;  %v1826_v47 = vadd.f32 1.0, %v4041_v37  ;;  %v2275_v54 = vsel %vm2259_vm1, %v1889_v23, 0.0  ;;  %v4702_v34 = vmin.f32 %v3818_v46, 0.0 }
 0x2c8   : > { %v2018_v45 = vsel %vm4050_vm7, %v2015_v56, %v2012_v0  ;;  %v2028_v1 = vadd.f32 1.0, %v4058_v57  ;;  %v2040_v60 = vmul.f32 -0.5, %v4005_v50  ;;  %v1935_v38 = vand.u32 2147483647, %v1903_v55  ;;  %v2969_v15 = vpop.eup %2968  ;;  %v1612_v56 = vpop.xlane.xlu0 %1611 }
 0x2c9   : > { %v1888_v52 = vsub.f32 %v4702_v34, %v1816_v35  ;;  %v2170_v58 = vmul.f32 1.442695, %v1889_v23  ;;  %v4078_v29 = vsub.f32 %v3983_v4, %v2018_v45  ;;  %v4081_v53 = vadd.f32 %v3602_v61, %v1549_v63 }
 0x2ca   : > { %2976 = vlog2.f32 %v2028_v1  ;;  %v4084_v31 = vadd.f32 %v3990_v3, %v2339_v49  ;;  %v1840_v46 = vmul.f32 %v3978_v30, %v1839_v27  ;;  %vm4087_vm14 = vcmp.lt.f32.partialorder %v1841_v11, 0.0004427343  ;;  %v2971_v48 = vpop.eup %2970 }
 0x2cb   : > { %v1951_v8 = vsub.f32 0.0, %v1935_v38  ;;  %v2300_v23 = vsel %vm2282_vm10, %v2275_v54, 0.0  ;;  %v2190_v0 = vmul.f32 1.442695, %v2139_v43  ;;  %v2326_v4 = vsel %vm2253_vm12, %v2139_v43, 0.0 }
 0x2cc   : > { %2978 = vlog2.f32 %v1826_v47  ;;  %v2973_v35 = vpop.eup %2972  ;;  %v2274_v3 = vsel %vm2258_vm5, %v1888_v52, 0.0  ;;  %v1837_v62 = vmul.f32 0.6931472, %v2969_v15  ;;  %v2041_v30 = vadd.f32 1.0, %v2040_v60 }
 0x2cd   : > { %v2043_v21 = vand.u32 2147483647, %v4005_v50  ;;  %2980 = vpow2.f32 %v2170_v58  ;;  %v2188_v45 = vmul.f32 1.442695, %v4078_v29  ;;  %v1974_v27 = vmul.f32 1.442695, %v1951_v8 }
 0x2ce   : > { %v1684_v11 = vand.u32 2147483647, %v4081_v53  ;;  %v2216_v63 = vsub.f32 %v3854_v32, %v2971_v48  ;;  %v4101_v49 = vsel %vm2282_vm10, %v2326_v4, 0.0  ;;  %v2168_v43 = vmul.f32 1.442695, %v1888_v52  ;;  %v4106_v1 = vpop.eup %2974  ;;  %v1621_v48 = vpop.xlane.xlu0 %1620 }
 0x2cf   : > { %v4104_v47 = vadd.f32 %v1612_v56, %v3602_v61  ;;  %v2298_v54 = vsel %vm2282_vm10, %v2274_v3, 0.0  ;;  %v2039_v34 = vmul.f32 0.6931472, %v2973_v35  ;;  %v2031_v60 = vmul.f32 -0.5, %v4058_v57  ;;  %v1555_v4 = vpop.xlane.xlu1 %1554 }
 0x2d0   : > { %2982 = vpow2.f32 %v1974_v27  ;;  %vm2261_vm0 = vcmp.lt.s32.totalorder %v3706_v18, 200  ;;  %v1843_v32 = vsel %vm4087_vm14, %v1840_v46, %v1837_v62  ;;  %v1829_v38 = vmul.f32 -0.5, %v4041_v37 }
 0x2d1   : > { %2984 = vpow2.f32 %v2190_v0  ;;  %v1700_v52 = vsub.f32 0.0, %v1684_v11  ;;  %v2042_v15 = vmul.f32 %v4005_v50, %v2041_v30  ;;  %vm4115_vm4 = vcmp.lt.f32.partialorder %v2043_v21, 0.0004427343 }
 0x2d2   : > { %2986 = vpow2.f32 %v2188_v45  ;;  %v1902_v8 = vsub.f32 0.0, %v4104_v47  ;;  %v2379_v0 = vsel %vm2250_vm8, %v2216_v63, 0.0  ;;  %v2299_v22 = vadd.f32 %v2298_v54, %v3986_v20 }
 0x2d3   : > { %2988 = vpow2.f32 %v2168_v43  ;;  %v1853_v46 = vadd.f32 1.0, %v4106_v1  ;;  %v4707_v35 = vmin.f32 %v3876_v44, 0.0  ;;  %v2045_v3 = vsel %vm4115_vm4, %v2042_v15, %v2039_v34 }
 0x2d4   : > { %v2977_v56 = vpop.eup %2976  ;;  %v2032_v62 = vadd.f32 1.0, %v2031_v60  ;;  %v1728_v30 = vmul.f32 1.442695, %v1700_v52  ;;  %v1830_v21 = vadd.f32 1.0, %v1829_v38  ;;  %v1832_v45 = vand.u32 2147483647, %v4041_v37  ;;  %v1618_v52 = vpop.xlane.xlu0 %1617 }
 0x2d5   : > { %v1891_v50 = vsub.f32 %v4707_v35, %v1843_v32  ;;  %v2034_v36 = vand.u32 2147483647, %v4058_v57  ;;  %v4132_v20 = vmin.f32 %v1903_v55, 0.0  ;;  %v2030_v11 = vmul.f32 0.6931472, %v2977_v56 }
 0x2d6   : > { %v2979_v27 = vpop.eup %2978  ;;  %2990 = vpow2.f32 %v1728_v30  ;;  %v1934_v44 = vand.u32 2147483647, %v1902_v8  ;;  %v4137_v63 = vadd.f32 %v3602_v61, %v1555_v4  ;;  %v2395_v43 = vsel %vm2282_vm10, %v2379_v0, 0.0  ;;  %v1558_v0 = vpop.xlane.xlu1 %1557 }
 0x2d7   : > { %v2141_v54 = vsub.f32 %v4020_v51, %v2045_v3  ;;  %v4141_v34 = vadd.f32 %v2300_v23, %v2299_v22  ;;  %2992 = vlog2.f32 %v1853_v46  ;;  %v4143_v60 = vpop.eup %2980  ;;  %v2325_v16 = vsel %vm2252_vm15, %v4078_v29, 0.0 }
 0x2d8   : > { %v2174_v55 = vmul.f32 1.442695, %v1891_v50  ;;  %v2033_v32 = vmul.f32 %v4058_v57, %v2032_v62  ;;  %v1950_v38 = vsub.f32 0.0, %v1934_v44  ;;  %v1828_v15 = vmul.f32 0.6931472, %v2979_v27 }
 0x2d9   : > { %vm4149_vm8 = vcmp.lt.f32.partialorder %v1832_v45, 0.0004427343  ;;  %vm4153_vm11 = vcmp.lt.f32.partialorder %v2034_v36, 0.0004427343  ;;  %v4158_v23 = vadd.f32 %v1621_v48, %v3602_v61  ;;  %vm2260_vm7 = vcmp.lt.s32.totalorder %v3709_v19, 200 }
 0x2da   : > { %v4160_v22 = vpop.eup %2982  ;;  %v1831_v57 = vmul.f32 %v4041_v37, %v1830_v21  ;;  %v2036_v29 = vsel %vm4153_vm11, %v2033_v32, %v2030_v11  ;;  %v1972_v46 = vmul.f32 1.442695, %v1950_v38  ;;  %v1686_v4 = vand.u32 2147483647, %v4137_v63 }
 0x2db   : > { %v2985_v56 = vpop.eup %2984  ;;  %v4168_v35 = vadd.f32 %v4061_v33, %v2395_v43  ;;  %v2342_v48 = vsel %vm2282_vm10, %v2325_v16, 0.0  ;;  %v2194_v3 = vmul.f32 1.442695, %v2141_v54  ;;  %v1668_v62 = vmin.f32 %v4081_v53, 0.0 }
 0x2dc   : > { %v2987_v30 = vpop.eup %2986  ;;  %2994 = vpow2.f32 %v2174_v55  ;;  %v2277_v37 = vsel %vm2261_vm0, %v1891_v50, 0.0  ;;  %v1856_v21 = vmul.f32 -0.5, %v4106_v1  ;;  %v4176_v45 = vadd.f32 %v3602_v61, %v1558_v0  ;;  %v1627_v55 = vpop.xlane.xlu0 %1626 }
 0x2dd   : > { %v4178_v36 = vpop.eup %2988  ;;  %v1834_v33 = vsel %vm4149_vm8, %v1831_v57, %v1828_v15  ;;  %v2140_v27 = vsub.f32 %v4056_v6, %v2036_v29  ;;  %v2055_v11 = vadd.f32 1.0, %v4160_v22  ;;  %v1905_v44 = vsub.f32 0.0, %v4158_v23 }
 0x2de   : > { %v2219_v43 = vsub.f32 %v3891_v41, %v2985_v56  ;;  %v2343_v50 = vadd.f32 %v2342_v48, %v4084_v31  ;;  %2996 = vpow2.f32 %v1972_v46  ;;  %v1702_v16 = vsub.f32 0.0, %v1686_v4 }
 0x2df   : > { %v2218_v32 = vsub.f32 %v3948_v14, %v2987_v30  ;;  %v4189_v38 = vsel %vm2282_vm10, %v2277_v37, 0.0  ;;  %2998 = vpow2.f32 %v2194_v3  ;;  %v1859_v15 = vand.u32 2147483647, %v4106_v1 }
 0x2e0   : > { %v4192_v6 = vpop.eup %2990  ;;  %v4712_v58 = vmin.f32 %v3913_v7, 0.0  ;;  %v1937_v41 = vand.u32 2147483647, %v1905_v44  ;;  %v1687_v31 = vand.u32 2147483647, %v4176_v45  ;;  %v4200_v0 = vadd.f32 %v1618_v52, %v3602_v61 }
 0x2e1   : > { %v2993_v14 = vpop.eup %2992  ;;  %v2192_v57 = vmul.f32 1.442695, %v2140_v27  ;;  %v1857_v29 = vadd.f32 1.0, %v1856_v21  ;;  %3000 = vlog2.f32 %v2055_v11  ;;  %v4203_v46 = vadd.f32 %v1627_v55, %v3602_v61 }
 0x2e2   : > { %v1890_v51 = vsub.f32 %v4712_v58, %v1834_v33  ;;  %v2382_v4 = vsel %vm2253_vm12, %v2219_v43, 0.0  ;;  %v2345_v7 = vadd.f32 %v4101_v49, %v2343_v50  ;;  %v1732_v56 = vmul.f32 1.442695, %v1702_v16  ;;  %v1624_v49 = vpop.xlane.xlu0 %1623 }
 0x2e3   : > { %v1953_v48 = vsub.f32 0.0, %v1937_v41  ;;  %v2381_v3 = vsel %vm2252_vm15, %v2218_v32, 0.0  ;;  %v2328_v52 = vsel %vm2255_vm3, %v2141_v54, 0.0  ;;  %vm4212_vm14 = vcmp.lt.f32.partialorder %v1859_v15, 0.0004427343 }
 0x2e4   : > { %v1844_v37 = vadd.f32 1.0, %v4192_v6  ;;  %v1855_v21 = vmul.f32 0.6931472, %v2993_v14  ;;  %v1703_v39 = vsub.f32 0.0, %v1687_v31  ;;  %v1904_v11 = vsub.f32 0.0, %v4200_v0 }
 0x2e5   : > { %v1978_v33 = vmul.f32 1.442695, %v1953_v48  ;;  %v2276_v43 = vsel %vm2260_vm7, %v1890_v51, 0.0  ;;  %3002 = vpow2.f32 %v2192_v57  ;;  %v1858_v40 = vmul.f32 %v4106_v1, %v1857_v29 }
 0x2e6   : > { %v1907_v54 = vsub.f32 0.0, %v4203_v46  ;;  %v4222_v50 = vpop.eup %2994  ;;  %v2398_v16 = vsel %vm2282_vm10, %v2381_v3, 0.0  ;;  %3004 = vpow2.f32 %v1732_v56  ;;  %v1734_v55 = vmul.f32 1.442695, %v1703_v39 }
 0x2e7   : > { %v1936_v32 = vand.u32 2147483647, %v1904_v11  ;;  %v2327_v15 = vsel %vm2254_vm2, %v2140_v27, 0.0  ;;  %v2058_v58 = vmul.f32 -0.5, %v4160_v22  ;;  %3006 = vlog2.f32 %v1844_v37 }
 0x2e8   : > { %v4231_v41 = vadd.f32 %v1624_v49, %v3602_v61  ;;  %v4233_v1 = vpop.eup %2996  ;;  %v1861_v31 = vsel %vm4212_vm14, %v1858_v40, %v1855_v21  ;;  %3008 = vpow2.f32 %v1978_v33  ;;  %v1939_v57 = vand.u32 2147483647, %v1907_v54 }
 0x2e9   : > { %v1952_v14 = vsub.f32 0.0, %v1936_v32  ;;  %v2999_v29 = vpop.eup %2998  ;;  %v2400_v56 = vsel %vm2282_vm10, %v2382_v4, 0.0  ;;  %v2348_v27 = vsel %vm2282_vm10, %v2328_v52, 0.0  ;;  %vm2263_vm12 = vcmp.lt.s32.totalorder %v3712_v24, 200  ;;  %v1633_v32 = vpop.xlane.xlu0 %1632 }
 0x2ea   : > { %v2046_v48 = vadd.f32 1.0, %v4233_v1  ;;  %3010 = vpow2.f32 %v1734_v55  ;;  %v2172_v3 = vmul.f32 1.442695, %v1890_v51  ;;  %v2346_v37 = vsel %vm2282_vm10, %v2327_v15, 0.0 }
 0x2eb   : > { %v4246_v30 = vmin.f32 %v1902_v8, 0.0  ;;  %v1976_v21 = vmul.f32 1.442695, %v1952_v14  ;;  %v3001_v33 = vpop.eup %3000  ;;  %v2399_v39 = vadd.f32 %v2398_v16, %v4168_v35  ;;  %v2302_v4 = vsel %vm2282_vm10, %v2276_v43, 0.0 }
 0x2ec   : > { %v4715_v52 = vmin.f32 %v3965_v26, 0.0  ;;  %v1906_v40 = vsub.f32 0.0, %v4231_v41  ;;  %v2221_v51 = vsub.f32 %v3953_v42, %v2999_v29  ;;  %v2059_v55 = vadd.f32 1.0, %v2058_v58 }
 0x2ed   : > { %3012 = vpow2.f32 %v1976_v21  ;;  %v1955_v15 = vsub.f32 0.0, %v1939_v57  ;;  %v2347_v47 = vadd.f32 %v2346_v37, %v2345_v7  ;;  %v2061_v8 = vand.u32 2147483647, %v4160_v22 }
 0x2ee   : > { %v1893_v49 = vsub.f32 %v4715_v52, %v1861_v31  ;;  %3014 = vlog2.f32 %v2046_v48  ;;  %v2057_v35 = vmul.f32 0.6931472, %v3001_v33  ;;  %v1847_v43 = vmul.f32 -0.5, %v4192_v6 }
 0x2ef   : > { %3016 = vpow2.f32 %v2172_v3  ;;  %v4258_v26 = vadd.f32 %v1633_v32, %v3602_v61  ;;  %v3003_v16 = vpop.eup %3002  ;;  %v4261_v31 = vadd.f32 %v2302_v4, %v4141_v34  ;;  %v4263_v42 = vadd.f32 %v2400_v56, %v2399_v39 }
 0x2f0   : > { %v2178_v58 = vmul.f32 1.442695, %v1893_v49  ;;  %v1938_v7 = vand.u32 2147483647, %v1906_v40  ;;  %v4267_v57 = vpop.eup %3004  ;;  %v2384_v29 = vsel %vm2255_vm3, %v2221_v51, 0.0  ;;  %v2060_v48 = vmul.f32 %v4160_v22, %v2059_v55  ;;  %v1630_v51 = vpop.xlane.xlu0 %1629 }
 0x2f1   : > { %v1850_v3 = vand.u32 2147483647, %v4192_v6  ;;  %v1982_v37 = vmul.f32 1.442695, %v1955_v15  ;;  %v3007_v21 = vpop.eup %3006  ;;  %vm4273_vm15 = vcmp.lt.f32.partialorder %v2061_v8, 0.0004427343  ;;  %v4277_v56 = vadd.f32 %v2348_v27, %v2347_v47 }
 0x2f2   : > { %v4281_v33 = vmin.f32 %v1905_v44, 0.0  ;;  %v4284_v10 = vpop.eup %3008  ;;  %v2063_v22 = vsel %vm4273_vm15, %v2060_v48, %v2057_v35  ;;  %v1848_v4 = vadd.f32 1.0, %v1847_v43  ;;  %v1954_v52 = vsub.f32 0.0, %v1938_v7 }
 0x2f3   : > { %v1909_v32 = vsub.f32 0.0, %v4258_v26  ;;  %v4292_v27 = vsel %vm2282_vm10, %v2384_v29, 0.0  ;;  %v2220_v23 = vsub.f32 %v3971_v25, %v3003_v16  ;;  %3018 = vpow2.f32 %v2178_v58 }
 0x2f4   : > { %v4289_v55 = vpop.eup %3010  ;;  %v1862_v44 = vadd.f32 1.0, %v4267_v57  ;;  %v4298_v15 = vsel %vm2263_vm12, %v1893_v49, 0.0  ;;  %vm4300_vm3 = vcmp.lt.f32.partialorder %v1850_v3, 0.0004427343  ;;  %v2049_v8 = vmul.f32 -0.5, %v4233_v1 }
 0x2f5   : > { %3020 = vpow2.f32 %v1982_v37  ;;  %v2143_v35 = vsub.f32 %v4132_v20, %v2063_v22  ;;  %vm2262_vm4 = vcmp.lt.s32.totalorder %v3744_v59, 200  ;;  %v1846_v43 = vmul.f32 0.6931472, %v3007_v21 }
 0x2f6   : > { %v2073_v25 = vadd.f32 1.0, %v4284_v10  ;;  %v1980_v16 = vmul.f32 1.442695, %v1954_v52  ;;  %v1849_v49 = vmul.f32 %v4192_v6, %v1848_v4  ;;  %v1871_v7 = vadd.f32 1.0, %v4289_v55 }
 0x2f7   : > { %v4308_v58 = vpop.eup %3012  ;;  %v4314_v29 = vmin.f32 %v1904_v11, 0.0  ;;  %v1941_v48 = vand.u32 2147483647, %v1909_v32  ;;  %v2383_v3 = vsel %vm2254_vm2, %v2220_v23, 0.0  ;;  %v2052_v37 = vand.u32 2147483647, %v4233_v1  ;;  %v1636_v11 = vpop.xlane.xlu0 %1635 }
 0x2f8   : > { %v3015_v20 = vpop.eup %3014  ;;  %3022 = vlog2.f32 %v1862_v44  ;;  %v2064_v21 = vadd.f32 1.0, %v4308_v58  ;;  %v2050_v6 = vadd.f32 1.0, %v2049_v8  ;;  %v4325_v0 = vadd.f32 %v1630_v51, %v3602_v61 }
 0x2f9   : > { %v4322_v34 = vpop.eup %3016  ;;  %3024 = vpow2.f32 %v1980_v16  ;;  %v1957_v22 = vsub.f32 0.0, %v1941_v48  ;;  %v2198_v4 = vmul.f32 1.442695, %v2143_v35  ;;  %v1852_v52 = vsel %vm4300_vm3, %v1849_v49, %v1846_v43 }
 0x2fa   : > { %v1865_v17 = vmul.f32 -0.5, %v4267_v57  ;;  %3026 = vlog2.f32 %v2073_v25  ;;  %v2402_v23 = vsel %vm2282_vm10, %v2383_v3, 0.0  ;;  %v2048_v44 = vmul.f32 0.6931472, %v3015_v20 }
 0x2fb   : > { %3028 = vlog2.f32 %v1871_v7  ;;  %v1986_v39 = vmul.f32 1.442695, %v1957_v22  ;;  %vm4331_vm2 = vcmp.lt.f32.partialorder %v2052_v37, 0.0004427343  ;;  %v1868_v51 = vand.u32 2147483647, %v4267_v57 }
 0x2fc   : > { %3030 = vlog2.f32 %v2064_v21  ;;  %v4337_v16 = vadd.f32 %v1636_v11, %v3602_v61  ;;  %v1892_v47 = vsub.f32 %v1668_v62, %v1852_v52  ;;  %v2051_v43 = vmul.f32 %v4233_v1, %v2050_v6 }
 0x2fd   : > { %3032 = vpow2.f32 %v1986_v39  ;;  %v4663_v25 = vsub.f32 0.0, %v4325_v0  ;;  %v4343_v49 = vpop.eup %3018  ;;  %v2330_v7 = vsel %vm2257_vm13, %v2143_v35, 0.0  ;;  %v1866_v48 = vadd.f32 1.0, %v1865_v17  ;;  %v1639_v17 = vpop.xlane.xlu0 %1638 }
 0x2fe   : > { %4722 = vst [vmem:[#allocation8_spill] sm:$0xff] %v4343_v49  ;;  %3034 = vpow2.f32 %v2198_v4  ;;  %v2076_v20 = vmul.f32 -0.5, %v4284_v10  ;;  %v4351_v37 = vadd.f32 %v2402_v23, %v4263_v42  ;;  %v2054_v53 = vsel %vm4331_vm2, %v2051_v43, %v2048_v44 }
 0x2ff   : > { %v4348_v3 = vpop.eup %3020  ;;  %v1874_v62 = vmul.f32 -0.5, %v4289_v55  ;;  %v4358_v1 = vmin.f32 %v1907_v54, 0.0  ;;  %vm4360_vm8 = vcmp.lt.f32.partialorder %v1868_v51, 0.0004427343  ;;  %v2079_v35 = vand.u32 2147483647, %v4284_v10 }
 0x300   : > { %v4367_v21 = vmin.f32 %v1906_v40, 0.0  ;;  %v4664_v42 = vsub.f32 0.0, %v4337_v16  ;;  %v4371_v6 = vsel %vm2282_vm10, %v2330_v7, 0.0  ;;  %v2176_v22 = vmul.f32 1.442695, %v1892_v47 }
 0x301   : > { %v2278_v46 = vsel %vm2262_vm4, %v1892_v47, 0.0  ;;  %v1940_v54 = vand.u32 2147483647, %v4663_v25  ;;  %v2142_v4 = vsub.f32 %v4246_v30, %v2054_v53  ;;  %v1867_v52 = vmul.f32 %v4267_v57, %v1866_v48 }
 0x302   : > { %v3023_v11 = vpop.eup %3022  ;;  %v2077_v41 = vadd.f32 1.0, %v2076_v20  ;;  %v2091_v40 = vadd.f32 1.0, %v4348_v3  ;;  %v1875_v44 = vadd.f32 1.0, %v1874_v62  ;;  %v1877_v8 = vand.u32 2147483647, %v4289_v55 }
 0x303   : > { %v4380_v23 = vpop.eup %3024  ;;  %v2067_v51 = vmul.f32 -0.5, %v4308_v58  ;;  %v4386_v47 = vmin.f32 %v1909_v32, 0.0  ;;  %v4389_v30 = vsel %vm2282_vm10, %v2278_v46, 0.0  ;;  %vm4391_vm11 = vcmp.lt.f32.partialorder %v2079_v35, 0.0004427343 }
 0x304   : > { %v3027_v43 = vpop.eup %3026  ;;  %v2082_v7 = vadd.f32 1.0, %v4380_v23  ;;  %v1942_v48 = vand.u32 2147483647, %v4664_v42  ;;  %3036 = vpow2.f32 %v2176_v22  ;;  %v1864_v53 = vmul.f32 0.6931472, %v3023_v11 }
 0x305   : > { %v3029_v20 = vpop.eup %3028  ;;  %v1956_v62 = vsub.f32 0.0, %v1940_v54  ;;  %v4399_v26 = vadd.f32 %v1639_v17, %v3602_v61  ;;  %v2196_v25 = vmul.f32 1.442695, %v2142_v4  ;;  %v2078_v46 = vmul.f32 %v4284_v10, %v2077_v41 }
 0x306   : > { %v3031_v32 = vpop.eup %3030  ;;  %v2070_v35 = vand.u32 2147483647, %v4308_v58  ;;  %3038 = vlog2.f32 %v2091_v40  ;;  %v1876_v49 = vmul.f32 %v4289_v55, %v1875_v44  ;;  %vm4406_vm14 = vcmp.lt.f32.partialorder %v1877_v8, 0.0004427343 }
 0x307   : > { %v4403_v14 = vpop.eup %3032  ;;  %v2068_v22 = vadd.f32 1.0, %v2067_v51  ;;  %3040 = vlog2.f32 %v2082_v7  ;;  %v2329_v61 = vsel %vm2256_vm9, %v2142_v4, 0.0  ;;  %v2075_v11 = vmul.f32 0.6931472, %v3027_v43  ;;  %v4733_v51 = vld [vmem:[#allocation7_spill] sm:$0xff] }
 0x308   : > { %v4410_v54 = vpop.eup %3034  ;;  %v2109_v10 = vadd.f32 1.0, %v4403_v14  ;;  %v1958_v41 = vsub.f32 0.0, %v1942_v48  ;;  %v1870_v40 = vsel %vm4360_vm8, %v1867_v52, %v1864_v53  ;;  %v2066_v17 = vmul.f32 0.6931472, %v3031_v32 }
 0x309   : > { %v1984_v55 = vmul.f32 1.442695, %v1956_v62  ;;  %v1911_v44 = vsub.f32 0.0, %v4399_v26  ;;  %3042 = vpow2.f32 %v2196_v25  ;;  %v1873_v8 = vmul.f32 0.6931472, %v3029_v20 }
 0x30a   : > { %vm4418_vm15 = vcmp.lt.f32.partialorder %v2070_v35, 0.0004427343  ;;  %v2085_v7 = vmul.f32 -0.5, %v4380_v23  ;;  %v2223_v4 = vsub.f32 %v4022_v28, %v4410_v54  ;;  %v2350_v43 = vsel %vm2282_vm10, %v2329_v61, 0.0 }
 0x30b   : > { %v2069_v39 = vmul.f32 %v4308_v58, %v2068_v22  ;;  %3044 = vlog2.f32 %v2109_v10  ;;  %v4731_v52 = vmin.f32 %v4137_v63, 0.0  ;;  %v2081_v25 = vsel %vm4391_vm11, %v2078_v46, %v2075_v11  ;;  %v4732_v22 = vld [vmem:[#allocation6_spill] sm:$0xff] }
 0x30c   : > { %v2094_v20 = vmul.f32 -0.5, %v4348_v3  ;;  %v1988_v53 = vmul.f32 1.442695, %v1958_v41  ;;  %v2097_v32 = vand.u32 2147483647, %v4348_v3  ;;  %3046 = vpow2.f32 %v1984_v55 }
 0x30d   : > { %v4429_v48 = vsub.f32 %v4731_v52, %v1870_v40  ;;  %v2072_v62 = vsel %vm4418_vm15, %v2069_v39, %v2066_v17  ;;  %v1943_v58 = vand.u32 2147483647, %v1911_v44  ;;  %v1879_v63 = vsel %vm4406_vm14, %v1876_v49, %v1873_v8 }
 0x30e   : > { %v2086_v35 = vadd.f32 1.0, %v2085_v7  ;;  %3048 = vpow2.f32 %v1988_v53  ;;  %v762_v57 = vadd.s32 112, %v4732_v22  ;;  %v4442_v46 = vpop.eup %3036  ;;  %v2145_v61 = vsub.f32 %v4281_v33, %v2081_v25 }
 0x30f   : > { %v2088_v11 = vand.u32 2147483647, %v4380_v23  ;;  %v1959_v10 = vsub.f32 0.0, %v1943_v58  ;;  %v763_v41 = vadd.s32 120, %v4732_v22  ;;  %v2144_v17 = vsub.f32 %v4314_v29, %v2072_v62 }
 0x310   : > { %v3039_v40 = vpop.eup %3038  ;;  %v2095_v55 = vadd.f32 1.0, %v2094_v20  ;;  %v4449_v42 = vadd.s32 %v4733_v51, %v762_v57  ;;  %v2305_v49 = vadd.f32 %v4189_v38, %v4261_v31  ;;  %v4734_v7 = vmin.f32 %v4176_v45, 0.0 }
 0x311   : > { %v3041_v8 = vpop.eup %3040  ;;  %v2112_v33 = vmul.f32 -0.5, %v4403_v14  ;;  %v1990_v52 = vmul.f32 1.442695, %v1959_v10  ;;  %v4459_v25 = vadd.s32 %v4733_v51, %v763_v41  ;;  %v2087_v29 = vmul.f32 %v4380_v23, %v2086_v35 }
 0x312   : > { %v4455_v39 = vsub.f32 %v4734_v7, %v1879_v63  ;;  %v2084_v53 = vmul.f32 0.6931472, %v3041_v8  ;;  %vm2264_vm3 = vcmp.lt.s32.totalorder %v4449_v42, 200  ;;  %v2307_v20 = vadd.f32 %v4389_v30, %v2305_v49 }
 0x313   : > { %v2202_v62 = vmul.f32 1.442695, %v2145_v61  ;;  %vm2089_vm2 = vcmp.lt.f32.partialorder %v2088_v11, 0.0004427343  ;;  %3050 = vpow2.f32 %v1990_v52  ;;  %vm2265_vm8 = vcmp.lt.s32.totalorder %v4459_v25, 200  ;;  %v3043_v45 = vpop.eup %3042 }
 0x314   : > { %v2200_v38 = vmul.f32 1.442695, %v2144_v17  ;;  %v2093_v31 = vmul.f32 0.6931472, %v3039_v40  ;;  %v2090_v58 = vsel %vm2089_vm2, %v2087_v29, %v2084_v53  ;;  %v2280_v63 = vsel %vm2264_vm3, %v4429_v48, 0.0 }
 0x315   : > { %v3045_v57 = vpop.eup %3044  ;;  %v2351_v23 = vadd.f32 %v2350_v43, %v4277_v56  ;;  %vm4469_vm11 = vcmp.lt.f32.partialorder %v2097_v32, 0.0004427343  ;;  %v2146_v30 = vsub.f32 %v4367_v21, %v2090_v58  ;;  %v2308_v11 = vsel %vm2282_vm10, %v4298_v15, 0.0 }
 0x316   : > { %v2096_v10 = vmul.f32 %v4348_v3, %v2095_v55  ;;  %v2113_v41 = vadd.f32 1.0, %v2112_v33  ;;  %v2281_v40 = vsel %vm2265_vm8, %v4455_v39, 0.0  ;;  %v2309_v51 = vadd.f32 %v2308_v11, %v2307_v20  ;;  %v4480_v49 = vpop.eup %3046 }
 0x317   : > { %3052 = vpow2.f32 %v2202_v62  ;;  %v2331_v56 = vsel %vm2258_vm5, %v2144_v17, 0.0  ;;  %v2115_v43 = vand.u32 2147483647, %v4403_v14  ;;  %v2310_v21 = vsel %vm2282_vm10, %v2280_v63, 0.0 }
 0x318   : > { %v4486_v32 = vpop.eup %3048  ;;  %3054 = vpow2.f32 %v2200_v38  ;;  %v2099_v15 = vsel %vm4469_vm11, %v2096_v10, %v2093_v31  ;;  %v2111_v3 = vmul.f32 0.6931472, %v3045_v57  ;;  %v2100_v55 = vadd.f32 1.0, %v4480_v49 }
 0x319   : > { %v2353_v8 = vadd.f32 %v4371_v6, %v2351_v23  ;;  %v2204_v7 = vmul.f32 1.442695, %v2146_v30  ;;  %v2118_v33 = vadd.f32 1.0, %v4486_v32  ;;  %v2312_v17 = vsel %vm2282_vm10, %v2281_v40, 0.0 }
 0x31a   : > { %v2354_v52 = vsel %vm2282_vm10, %v2331_v56, 0.0  ;;  %v2114_v53 = vmul.f32 %v4403_v14, %v2113_v41  ;;  %3056 = vlog2.f32 %v2100_v55  ;;  %v2311_v29 = vadd.f32 %v2310_v21, %v2309_v51 }
 0x31b   : > { %v2180_v20 = vmul.f32 1.442695, %v4429_v48  ;;  %v2147_v62 = vsub.f32 %v4358_v1, %v2099_v15  ;;  %vm4498_vm14 = vcmp.lt.f32.partialorder %v2115_v43, 0.0004427343  ;;  %3058 = vlog2.f32 %v2118_v33 }
 0x31c   : > { %v2222_v6 = vsub.f32 %v4027_v13, %v3043_v45  ;;  %v2332_v31 = vsel %vm2259_vm1, %v2145_v61, 0.0  ;;  %v2117_v58 = vsel %vm4498_vm14, %v2114_v53, %v2111_v3  ;;  %v2313_v14 = vadd.f32 %v2312_v17, %v2311_v29 }
 0x31d   : > { %v4507_v63 = vpop.eup %3050  ;;  %v2355_v57 = vadd.f32 %v2354_v52, %v2353_v8  ;;  %3060 = vpow2.f32 %v2204_v7  ;;  %v4739_v1 = vsub.f32 0.0, %v4325_v0  ;;  %v2103_v23 = vmul.f32 -0.5, %v4480_v49 }
 0x31e   : > { %v2333_v35 = vsel %vm2260_vm7, %v2146_v30, 0.0  ;;  %v4740_v13 = vsub.f32 0.0, %v4337_v16  ;;  %v2121_v61 = vmul.f32 -0.5, %v4486_v32  ;;  %v2127_v11 = vadd.f32 1.0, %v4507_v63  ;;  %2314 = vadd.xlane.f32.xlu0 %v2313_v14 }
 0x31f   : > { %v1924_v48 = vmin.f32 %v4739_v1, 0.0  ;;  %3062 = vpow2.f32 %v2180_v20  ;;  %v2356_v10 = vsel %vm2282_vm10, %v2332_v31, 0.0  ;;  %v2206_v41 = vmul.f32 1.442695, %v2147_v62 }
 0x320   : > { %v1926_v45 = vmin.f32 %v4740_v13, 0.0  ;;  %v2149_v0 = vsub.f32 %v4386_v47, %v2117_v58  ;;  %v2385_v40 = vsel %vm2256_vm9, %v2222_v6, 0.0  ;;  %v4523_v51 = vmul.f32 1.442695, %v4455_v39 }
 0x321   : > { %v2334_v16 = vsel %vm2261_vm0, %v2147_v62, 0.0  ;;  %3064 = vlog2.f32 %v2127_v11  ;;  %v4527_v30 = vpop.eup %3052  ;;  %v2357_v56 = vadd.f32 %v2356_v10, %v2355_v57  ;;  %v2358_v43 = vsel %vm2282_vm10, %v2333_v35, 0.0 }
 0x322   : > { %v2104_v21 = vadd.f32 1.0, %v2103_v23  ;;  %v1927_v15 = vmin.f32 %v1911_v44, 0.0  ;;  %v3055_v47 = vpop.eup %3054  ;;  %v2106_v9 = vand.u32 2147483647, %v4480_v49  ;;  %v2122_v3 = vadd.f32 1.0, %v2121_v61 }
 0x323   : > { %v2130_v39 = vmul.f32 -0.5, %v4507_v63  ;;  %v2386_v55 = vsel %vm2257_vm13, %v2223_v4, 0.0  ;;  %3066 = vpow2.f32 %v2206_v41  ;;  %v2360_v8 = vsel %vm2282_vm10, %v2334_v16, 0.0 }
 0x324   : > { %v2210_v7 = vmul.f32 1.442695, %v2149_v0  ;;  %v2124_v33 = vand.u32 2147483647, %v4486_v32  ;;  %v3057_v26 = vpop.eup %3056  ;;  %v2359_v44 = vadd.f32 %v2358_v43, %v2357_v56  ;;  %v2225_v17 = vsub.f32 %v4143_v60, %v4527_v30 }
 0x325   : > { %v2405_v52 = vadd.f32 %v4292_v27, %v4351_v37  ;;  %v2406_v53 = vsel %vm2282_vm10, %v2385_v40, 0.0  ;;  %v3059_v28 = vpop.eup %3058  ;;  %v2224_v12 = vsub.f32 %v4178_v36, %v3055_v47  ;;  %v2336_v54 = vsel %vm2263_vm12, %v2149_v0, 0.0 }
 0x326   : > { %v2102_v4 = vmul.f32 0.6931472, %v3057_v26  ;;  %v2105_v29 = vmul.f32 %v4480_v49, %v2104_v21  ;;  %vm2107_vm9 = vcmp.lt.f32.partialorder %v2106_v9, 0.0004427343  ;;  %v2120_v20 = vmul.f32 0.6931472, %v3059_v28 }
 0x327   : > { %v2123_v62 = vmul.f32 %v4486_v32, %v2122_v3  ;;  %v2131_v38 = vadd.f32 1.0, %v2130_v39  ;;  %v3061_v60 = vpop.eup %3060  ;;  %3068 = vpow2.f32 %v2210_v7  ;;  %vm2125_vm13 = vcmp.lt.f32.partialorder %v2124_v33, 0.0004427343  ;;  %v4741_v26 = vld [vmem:[#allocation8_spill] sm:$0xff] }
 0x328   : > { %v2108_v6 = vsel %vm2107_vm9, %v2105_v29, %v2102_v4  ;;  %v2408_v27 = vsel %vm2282_vm10, %v2386_v55, 0.0  ;;  %v2133_v36 = vand.u32 2147483647, %v4507_v63  ;;  %v2361_v58 = vadd.f32 %v2360_v8, %v2359_v44 }
 0x329   : > { %v2148_v37 = vsub.f32 %v1924_v48, %v2108_v6  ;;  %v2126_v31 = vsel %vm2125_vm13, %v2123_v62, %v2120_v20  ;;  %v3063_v14 = vpop.eup %3062  ;;  %v2364_v49 = vsel %vm2282_vm10, %v2336_v54, 0.0  ;;  %v2387_v1 = vsel %vm2258_vm5, %v2224_v12, 0.0 }
 0x32a   : > { %v2150_v57 = vsub.f32 %v1926_v45, %v2126_v31  ;;  %v2407_v32 = vadd.f32 %v2406_v53, %v2405_v52  ;;  %v2132_v61 = vmul.f32 %v4507_v63, %v2131_v38  ;;  %v2226_v48 = vsub.f32 %v4322_v34, %v3061_v60 }
 0x32b   : > { %v3065_v23 = vpop.eup %3064  ;;  %v2208_v35 = vmul.f32 1.442695, %v2148_v37  ;;  %v2335_v13 = vsel %vm2262_vm4, %v2148_v37, 0.0  ;;  %vm2134_vm15 = vcmp.lt.f32.partialorder %v2133_v36, 0.0004427343  ;;  %v2410_v0 = vsel %vm2282_vm10, %v2387_v1, 0.0 }
 0x32c   : > { %v2362_v11 = vsel %vm2282_vm10, %v2335_v13, 0.0  ;;  %v2212_v10 = vmul.f32 1.442695, %v2150_v57  ;;  %v2129_v41 = vmul.f32 0.6931472, %v3065_v23  ;;  %v2337_v45 = vsel %vm2264_vm3, %v2150_v57, 0.0 }
 0x32d   : > { %3070 = vpow2.f32 %v2208_v35  ;;  %v2363_v2 = vadd.f32 %v2362_v11, %v2361_v58  ;;  %v3067_v40 = vpop.eup %3066  ;;  %v2366_v30 = vsel %vm2282_vm10, %v2337_v45, 0.0  ;;  %v2409_v63 = vadd.f32 %v2408_v27, %v2407_v32 }
 0x32e   : > { %3072 = vpow2.f32 %v2212_v10  ;;  %v2135_v16 = vsel %vm2134_vm15, %v2132_v61, %v2129_v41  ;;  %v2388_v43 = vsel %vm2259_vm1, %v2225_v17, 0.0  ;;  %v2389_v21 = vsel %vm2260_vm7, %v2226_v48, 0.0 }
 0x32f   : > { %v2151_v56 = vsub.f32 %v1927_v15, %v2135_v16  ;;  %v2365_v34 = vadd.f32 %v2364_v49, %v2363_v2  ;;  %v2411_v47 = vadd.f32 %v2410_v0, %v2409_v63  ;;  %3074 = vpow2.f32 %v4523_v51 }
 0x330   : > { %v2227_v15 = vsub.f32 %v4222_v50, %v3067_v40  ;;  %v2412_v5 = vsel %vm2282_vm10, %v2388_v43, 0.0  ;;  %v2414_v19 = vsel %vm2282_vm10, %v2389_v21, 0.0  ;;  %vm2435_vm1 = vcmp.eq.s32.totalorder %v4732_v22, 1 }
 0x331   : > { %v2214_v9 = vmul.f32 1.442695, %v2151_v56  ;;  %v2338_v3 = vsel %vm2265_vm8, %v2151_v56, 0.0  ;;  %v2367_v39 = vadd.f32 %v2366_v30, %v2365_v34  ;;  %v3069_v55 = vpop.eup %3068  ;;  %v2413_v33 = vadd.f32 %v2412_v5, %v2411_v47 }
 0x332   : > { %v2368_v8 = vsel %vm2282_vm10, %v2338_v3, 0.0  ;;  %v2229_v44 = vsub.f32 %v4741_v26, %v3069_v55  ;;  %v2390_v17 = vsel %vm2261_vm0, %v2227_v15, 0.0 }
 0x333   : > { %3076 = vpow2.f32 %v2214_v9  ;;  %v2369_v7 = vadd.f32 %v2368_v8, %v2367_v39  ;;  %v2415_v52 = vadd.f32 %v2414_v19, %v2413_v33  ;;  %v2416_v50 = vsel %vm2282_vm10, %v2390_v17, 0.0 }
 0x334   : > { %v2392_v4 = vsel %vm2263_vm12, %v2229_v44, 0.0 }
 0x335   : > { %2370 = vadd.xlane.f32.xlu1 %v2369_v7  ;;  %v2417_v29 = vadd.f32 %v2416_v50, %v2415_v52 }
 0x337   : > { %v3071_v53 = vpop.eup %3070 }
 0x338   : > { %v3073_v51 = vpop.eup %3072  ;;  %v2228_v28 = vsub.f32 %v4442_v46, %v3071_v53  ;;  %v2420_v46 = vsel %vm2282_vm10, %v2392_v4, 0.0 }
 0x339   : > { %v2230_v12 = vsub.f32 %v3063_v14, %v3073_v51  ;;  %v3075_v62 = vpop.eup %3074 }
 0x33a   : > { %v2391_v54 = vsel %vm2262_vm4, %v2228_v28, 0.0 }
 0x33b   : > { %v2393_v20 = vsel %vm2264_vm3, %v2230_v12, 0.0  ;;  %v2418_v18 = vsel %vm2282_vm10, %v2391_v54, 0.0 }
 0x33c   : > { %v2419_v38 = vadd.f32 %v2418_v18, %v2417_v29  ;;  %v2422_v6 = vsel %vm2282_vm10, %v2393_v20, 0.0 }
 0x33d   : > { %v3077_v60 = vpop.eup %3076 }
 0x33e   : > { %v2231_v27 = vsub.f32 %v3075_v62, %v3077_v60  ;;  %v2421_v37 = vadd.f32 %v2420_v46, %v2419_v38 }
 0x340   : > { %v2394_v59 = vsel %vm2265_vm8, %v2231_v27, 0.0  ;;  %v2423_v24 = vadd.f32 %v2422_v6, %v2421_v37 }
 0x341   : > { %v2424_v31 = vsel %vm2282_vm10, %v2394_v59, 0.0  ;;  %vm2436_vm10 = vcmp.eq.s32.totalorder %v4732_v22, 2 }
 0x342   : > { %v2425_v36 = vadd.f32 %v2424_v31, %v2423_v24 }
 0x344   : > { %2426 = vadd.xlane.f32.xlu0 %v2425_v36 }
 0x3ab   : > { %v2315_v42 = vpop.xlane.xlu0 %2314 }
 0x3ac   : > { %v2316_v58 = vrot.slane %v2315_v42, 4 }
 0x3ae   : > { %v2317_v14 = vadd.f32 %v2316_v58, %v2315_v42 }
 0x3b0   : > { %v2318_v57 = vrot.slane %v2317_v14, 2 }
 0x3b2   : > { %v2319_v49 = vadd.f32 %v2318_v57, %v2317_v14 }
 0x3b4   : > { %v2320_v1 = vrot.slane %v2319_v49, 1 }
 0x3b6   : > { %v2321_v32 = vadd.f32 %v2320_v1, %v2319_v49 }
 0x3b8   : > { %2839 = vpush %v2321_v32 }
 0x3c2   : > { %v2371_v23 = vpop.xlane.xlu1 %2370 }
 0x3c3   : > { %v2372_v35 = vrot.slane %v2371_v23, 4 }
 0x3c5   : > { %v2373_v13 = vadd.f32 %v2372_v35, %v2371_v23 }
 0x3c7   : > { %v2374_v61 = vrot.slane %v2373_v13, 2 }
 0x3c9   : > { %v2375_v25 = vadd.f32 %v2374_v61, %v2373_v13 }
 0x3cb   : > { %v2376_v48 = vrot.slane %v2375_v25, 1 }
 0x3cd   : > { %v2377_v11 = vadd.f32 %v2376_v48, %v2375_v25 }
 0x3cf   : > { %2841 = vpush %v2377_v11 }
 0x3d1   : > { %v2427_v10 = vpop.xlane.xlu0 %2426 }
 0x3d2   : > { %v2428_v41 = vrot.slane %v2427_v10, 4 }
 0x3d4   : > { %v2429_v45 = vadd.f32 %v2428_v41, %v2427_v10 }
 0x3d6   : > { %v2430_v2 = vrot.slane %v2429_v45, 2 }
 0x3d8   : > { %v2431_v0 = vadd.f32 %v2430_v2, %v2429_v45 }
 0x3da   : > { %v2432_v40 = vrot.slane %v2431_v0, 1 }
 0x3dc   : > { %v2433_v16 = vadd.f32 %v2432_v40, %v2431_v0 }
 0x3de   : > { %2843 = vpush %v2433_v16 }
 0x3e9   : > { %s2840_s22 = spop %2839 }
 0x3ea   : > { %v2441_v34 = vstv %s2840_s22  ;;  %s3082_s22 = sshll.u32 %s3144_s9, 4  ;;  %s3083_s22 = int_to_ptr.vmem [resolvable:$false] %s3082_s22 }
 0x3eb   : > { %s3084_s14 = scalar_lea.vmem %s3083_s22, 256  ;;  %p3085_p1 = scmp.lt.s32.totalorder %s4603_s30, %s3083_s22 }
 0x3ec   : > { %p3086_p2 = scmp.lt.s32.totalorder %s3084_s14, %s3078_s21 }
 0x3ee   : > { %p3087_p3 = por %p3086_p2, %p3085_p1 }
 0x3f0   : > { %p3088_p4 = pnand %p3087_p3, %p3081_p0 }
 0x400   : > { %s2842_s26 = spop %2841 }
 0x401   : > { %v2439_v63 = vstv %s2842_s26 }
 0x40f   : > { %s2844_s27 = spop %2843 }
 0x410   : > { %v2437_v30 = vstv %s2844_s27 }
 0x411   : > { %v2438_v56 = vsel %vm2436_vm10, %v2437_v30, 0.0 }
 0x412   : > { %v2440_v43 = vsel %vm2435_vm1, %v2439_v63, %v2438_v56 }
 0x413   : > { %v2442_v21 = vsel %vm764_vm6, %v2441_v34, %v2440_v43 }
 0x414   : > { %2443 = vst [vmem:[%s383_s29] sm:$0xff] %v2442_v21 }
 0x415   : > { %3091 = shalt.err (!%p3088_p4)
}
 0x416   : > { %s3092_s19 = scalar_lea.hbm %s4601_s12, 128  ;;  %s3096_s29 = scalar_lea.hbm %s4655_s10, 256 }
 0x417   : > { %p3093_p7 = scmp.ne.s32.totalorder %s4601_s12, %s3092_s19  ;;  %p3097_p10 = scmp.lt.u32.totalorder %s4601_s12, %s4655_s10 }
 0x418   : > { %p3098_p11 = scmp.lt.u32.totalorder %s3096_s29, %s3092_s19  ;;  %p3100_p13 = scmp.lt.u32.totalorder %s3092_s19, %s4601_s12 }
 0x419   : > { %p3094_p8 = pnand %p3093_p7, %p3241_p5 }
 0x41a   : > { %p3099_p12 = por %p3098_p11, %p3097_p10 }
 0x41b   : > { %p3095_p9 = pneg %p3094_p8 }
 0x41c   : > { %p3101_p0 = por %p3100_p13, %p3099_p12 }
 0x41e   : > { %p3102_p1 = pnand %p3101_p0, %p3095_p9 }
 0x420   : > { %3105 = shalt.err (!%p3102_p1)
}
 0x421   : > { %2845 = dma.vmem_to_hbm [thread:$0]  (%p3241_p5), %s4603_s30, 128, %s4601_s12, %s2445_s13  }
 0x422 PF: > { %p2851_p2 = scmp.ge.s32.totalorder %s3140_s18, 2  ;;  %s2470_s21 = sand.u32 1, %s3128_s15  }
 0x423   : > { %s2471_s9 = scalar_lea.sflag [#allocation4], %s2470_s21 }
 0x424   : > { %p2848_p3 = pnand %p2851_p2, %p3245_p6 }
 0x426   : > { %3123 = dma.done.wait (!%p2848_p3), %s2471_s9, 128  }
 0x427   : > { %3125 = vsyncadd (!%p2848_p3), %s2471_s9, 4294967168  ;;  %p21_p4 = scmp.ge.s32.totalorder %s3228_s20, 4   ;;  %s4742_s15 = smov %s3132_s16 }
 0x428   : > { %s4743_s16 = smov %s3136_s17  ;;  %s4744_s17 = smov %s3239_s23 }
 0x429   : > { %s4745_s18 = smov %s3228_s20  ;;  %23 = sbr.rel (!%p21_p4) target bundleno = 5 (0x5), region = 101 }
 0x430   :  { %2476 = vsyncpa [#allocation4], 1 }
 0x431   :  { %2478 = vsyncpa [#allocation4 + $0x1], 1 }

</bundles_post_ra>
